<compile_context>
chip_gen: v7x
topology: tpu7x:2x2x1
jax: 0.10.0
libtpu: 0.0.40
codegen_flags: <defaults>
</compile_context>

<pallas_src>
import functools

import jax
import jax.numpy as jnp
from jax import lax
from jax.experimental import pallas as pl
from jax.experimental.pallas import tpu as pltpu

BN_EPS = 1e-5
COUT_PAD = 8                    # out-channels padded to one sublane tile
VMEM_LIMIT = 32 * 1024 * 1024   # generous; per-step working set here is tiny


# ------------------------------ geometry & packing ------------------------------ #
def _branch_geom(H, W, K, pad):
    Hp, Wp = H + 2 * pad, W + 2 * pad
    Ho, Wo = Hp - K + 1, Wp - K + 1
    L = Ho * Wp                  # flat conv-output length (cols >= Wo are garbage)
    Sx = Hp * Wp + (K - 1)       # flat padded-input length + tail for the max tap shift
    return dict(Hp=Hp, Wp=Wp, Ho=Ho, Wo=Wo, L=L, Sx=Sx)


def _pack_input(x_nchw, pad, Sx):
    """NCHW -> [N, Cin, Hp*Wp (+tail)] bf16: channels in sublanes, spatial in lanes."""
    N, Cin, H, W = x_nchw.shape
    xp = jnp.pad(x_nchw, ((0, 0), (0, 0), (pad, pad), (pad, pad)))
    xf = xp.reshape(N, Cin, (H + 2 * pad) * (W + 2 * pad))
    xf = jnp.pad(xf, ((0, 0), (0, 0), (0, Sx - xf.shape[-1])))
    return xf.astype(jnp.bfloat16)


def _pack_weight(w, K):
    """[Cout, Cin, K, K] -> [COUT_PAD, K*K*Cin] bf16; row index (kh*K+kw)*Cin + c
    matches the in-kernel tap/channel stacking order."""
    Cout, Cin = w.shape[0], w.shape[1]
    wp = jnp.transpose(w, (0, 2, 3, 1)).reshape(Cout, K * K * Cin)
    wp = jnp.pad(wp, ((0, COUT_PAD - Cout), (0, 0)))
    return wp.astype(jnp.bfloat16)


# --------------------------------- kernel bodies --------------------------------- #
def _conv_taps(x_ref, w_ref, *, K, Wp, L):
    """Implicit im2col: K*K lane-shifted slices of the flat padded image, stacked along
    the contraction (sublane) axis, one 36-deep MXU matmul.  Lanes = spatial positions.

    x_ref: [Cin, Sx] bf16    w_ref: [COUT_PAD, K*K*Cin] bf16
    returns [COUT_PAD, L] f32
    """
    taps = []
    for kh in range(K):
        for kw in range(K):
            s = kh * Wp + kw
            taps.append(x_ref[:, s:s + L].astype(jnp.float32))   # [Cin, L]
    xcat = jnp.concatenate(taps, axis=0).astype(jnp.bfloat16)    # [K*K*Cin, L]
    return jnp.dot(w_ref[...], xcat, preferred_element_type=jnp.float32)


def _stats_kernel(xh_ref, xm_ref, xl_ref, wh_ref, wm_ref, wl_ref,
                  sum_h, sq_h, sum_m, sq_m, sum_l, sq_l, *, K, geoms):
    """Pass 1: per-image BatchNorm batch statistics for all three branches."""
    xs = (xh_ref, xm_ref, xl_ref)
    ws = (wh_ref, wm_ref, wl_ref)
    sums = (sum_h, sum_m, sum_l)
    sqs = (sq_h, sq_m, sq_l)
    for i in range(3):
        Wp, Wo, L = geoms[i]
        y = _conv_taps(xs[i], ws[i], K=K, Wp=Wp, L=L)             # [COUT_PAD, L] f32
        col = lax.broadcasted_iota(jnp.int32, (1, L), 1) % Wp
        ym = jnp.where(col < Wo, y, 0.0)                          # mask garbage columns
        sums[i][...] = jnp.sum(ym, axis=1, keepdims=True)         # [COUT_PAD, 1]
        sqs[i][...] = jnp.sum(ym * ym, axis=1, keepdims=True)


def _apply_kernel(xh_ref, xm_ref, xl_ref, wh_ref, wm_ref, wl_ref,
                  sc_h, sc_m, sc_l, sf_h, sf_m, sf_l,
                  o_h, o_m, o_l, *, K, geoms, couts):
    """Pass 2: recompute the conv (cheap) and apply the per-channel BN affine."""
    xs = (xh_ref, xm_ref, xl_ref)
    ws = (wh_ref, wm_ref, wl_ref)
    scs = (sc_h, sc_m, sc_l)
    sfs = (sf_h, sf_m, sf_l)
    outs = (o_h, o_m, o_l)
    for i in range(3):
        Wp, L = geoms[i]
        y = _conv_taps(xs[i], ws[i], K=K, Wp=Wp, L=L)             # [COUT_PAD, L] f32
        yn = y * scs[i][...] + sfs[i][...]                        # per-channel affine
        outs[i][...] = yn[:couts[i], :]                           # drop channel padding


# --------------------------------- pallas wrappers -------------------------------- #
def conv_stats_pallas(xs, ws, geoms, K):
    N = xs[0].shape[0]
    kernel = functools.partial(
        _stats_kernel, K=K,
        geoms=tuple((g["Wp"], g["Wo"], g["L"]) for g in geoms))
    in_specs = ([pl.BlockSpec((None,) + x.shape[1:], lambda n: (n, 0, 0)) for x in xs]
                + [pl.BlockSpec(w.shape, lambda n: (0, 0)) for w in ws])
    out_shape = tuple(jax.ShapeDtypeStruct((N, COUT_PAD, 1), jnp.float32)
                      for _ in range(6))
    out_specs = tuple(pl.BlockSpec((None, COUT_PAD, 1), lambda n: (n, 0, 0))
                      for _ in range(6))
    return pl.pallas_call(
        kernel,
        out_shape=out_shape,
        grid=(N,),
        in_specs=in_specs,
        out_specs=out_specs,
        compiler_params=pltpu.CompilerParams(
            dimension_semantics=("parallel",),      # per-image stats -> no accumulation
            vmem_limit_bytes=VMEM_LIMIT),
    )(*xs, *ws)


def conv_bn_apply_pallas(xs, ws, scales, shifts, geoms, couts, K):
    N = xs[0].shape[0]
    kernel = functools.partial(
        _apply_kernel, K=K,
        geoms=tuple((g["Wp"], g["L"]) for g in geoms),
        couts=tuple(couts))
    in_specs = ([pl.BlockSpec((None,) + x.shape[1:], lambda n: (n, 0, 0)) for x in xs]
                + [pl.BlockSpec(w.shape, lambda n: (0, 0)) for w in ws]
                + [pl.BlockSpec((COUT_PAD, 1), lambda n: (0, 0)) for _ in scales]
                + [pl.BlockSpec((COUT_PAD, 1), lambda n: (0, 0)) for _ in shifts])
    out_shape = tuple(jax.ShapeDtypeStruct((N, c, g["L"]), jnp.float32)
                      for c, g in zip(couts, geoms))
    out_specs = tuple(pl.BlockSpec((None, c, g["L"]), lambda n: (n, 0, 0))
                      for c, g in zip(couts, geoms))
    return pl.pallas_call(
        kernel,
        out_shape=out_shape,
        grid=(N,),
        in_specs=in_specs,
        out_specs=out_specs,
        compiler_params=pltpu.CompilerParams(
            dimension_semantics=("parallel",),
            vmem_limit_bytes=VMEM_LIMIT),
    )(*xs, *ws, *scales, *shifts)


# ------------------------------------ JAX glue ------------------------------------ #
def maxpool_nchw(x, k):
    """nn.MaxPool2d(kernel_size=(k,k), stride=k) on NCHW (H % k == 0, W % k == 0)."""
    N, C, H, W = x.shape
    return x.reshape(N, C, H // k, k, W // k, k).max(axis=(3, 5))


def conv_bn_act2_forward(x, params, K=3, pad=1):
    """Conv_BN_ACT2.forward for a single-tensor input (x_m = x_l = None path)."""
    N = x.shape[0]
    branches = [
        (x,                  params["w_h2h"], params["g_h"], params["b_h"]),
        (maxpool_nchw(x, 2), params["w_h2m"], params["g_m"], params["b_m"]),  # downsample
        (maxpool_nchw(x, 4), params["w_h2l"], params["g_l"], params["b_l"]),  # doubledownsample
    ]

    geoms, xps, wps, gammas, betas, couts = [], [], [], [], [], []
    for xb, wb, g, b in branches:
        geom = _branch_geom(xb.shape[2], xb.shape[3], K, pad)
        geoms.append(geom)
        xps.append(_pack_input(xb, pad, geom["Sx"]))
        wps.append(_pack_weight(wb, K))
        couts.append(wb.shape[0])
        gammas.append(jnp.pad(g, (0, COUT_PAD - g.shape[0])))
        betas.append(jnp.pad(b, (0, COUT_PAD - b.shape[0])))

    # Pass 1: per-image BN batch statistics for all three branches (one pallas_call).
    stats = conv_stats_pallas(xps, wps, geoms, K)

    # Per-channel BN affine from batch statistics (a handful of scalars -> plain JAX).
    scales, shifts = [], []
    for i, geom in enumerate(geoms):
        count = float(N * geom["Ho"] * geom["Wo"])
        s = jnp.sum(stats[2 * i], axis=0)[:, 0]              # [COUT_PAD]
        q = jnp.sum(stats[2 * i + 1], axis=0)[:, 0]
        mean = s / count
        var = jnp.maximum(q / count - mean * mean, 0.0)      # biased var (BN train mode)
        scale = gammas[i] * lax.rsqrt(var + BN_EPS)          # zero for padded channels
        shift = betas[i] - mean * scale
        scales.append(scale.reshape(COUT_PAD, 1).astype(jnp.float32))
        shifts.append(shift.reshape(COUT_PAD, 1).astype(jnp.float32))

    # Pass 2: fused conv + BN affine, writing the final (small) outputs directly.
    ys = conv_bn_apply_pallas(xps, wps, scales, shifts, geoms, couts, K)

    outs = []
    for y, geom, cout in zip(ys, geoms, couts):
        out = y.reshape(N, cout, geom["Ho"], geom["Wp"])[:, :, :, :geom["Wo"]]
        outs.append(out)
    # TODO(synk): tuple-input path of OctaveConv2 (m2*/l2* convs + up/down mixing) is
    # unused for a single-tensor input and is not implemented here.
    return tuple(outs)


# ------------------------------------ Reference ------------------------------------ #
def ref_conv_bn(x, w, gamma, beta, pad):
    # Same numerics as the kernel path: bf16 conv inputs, f32 accumulation, f32 BN.
    y = lax.conv_general_dilated(
        x.astype(jnp.bfloat16), w.astype(jnp.bfloat16),
        window_strides=(1, 1), padding=[(pad, pad), (pad, pad)],
        dimension_numbers=("NCHW", "OIHW", "NCHW"),
        preferred_element_type=jnp.float32)
    mean = y.mean(axis=(0, 2, 3), keepdims=True)
    var = ((y - mean) ** 2).mean(axis=(0, 2, 3), keepdims=True)
    return ((y - mean) * lax.rsqrt(var + BN_EPS)) * gamma.reshape(1, -1, 1, 1) \
        + beta.reshape(1, -1, 1, 1)


# -------------------------------------- Main -------------------------------------- #
if __name__ == "__main__":
    # Module config: in_channels=4, out_channels=8, kernel_size=3, padding=1,
    # alpha_h_in=1.0, alpha_h_out=0.5, alpha_m_out=0.25, alpha_l_out=0.25
    #   -> Cout_h=4, Cout_m=2, Cout_l=2, bias=False, BatchNorm2d (training mode).
    N, Cin, H, W = 2, 4, 16, 16
    Cout_h, Cout_m, Cout_l = 4, 2, 2
    K, pad = 3, 1

    key = jax.random.PRNGKey(0)
    kx, kh, km, kl = jax.random.split(key, 4)
    fan_in = Cin * K * K
    std = (2.0 / fan_in) ** 0.5

    x = jax.random.normal(kx, (N, Cin, H, W), dtype=jnp.float32)
    params = {
        "w_h2h": std * jax.random.normal(kh, (Cout_h, Cin, K, K), dtype=jnp.float32),
        "w_h2m": std * jax.random.normal(km, (Cout_m, Cin, K, K), dtype=jnp.float32),
        "w_h2l": std * jax.random.normal(kl, (Cout_l, Cin, K, K), dtype=jnp.float32),
        # BatchNorm2d default init: weight=1, bias=0
        "g_h": jnp.ones((Cout_h,), jnp.float32), "b_h": jnp.zeros((Cout_h,), jnp.float32),
        "g_m": jnp.ones((Cout_m,), jnp.float32), "b_m": jnp.zeros((Cout_m,), jnp.float32),
        "g_l": jnp.ones((Cout_l,), jnp.float32), "b_l": jnp.zeros((Cout_l,), jnp.float32),
    }

    fwd = jax.jit(conv_bn_act2_forward, static_argnames=("K", "pad"))
    out_h, out_m, out_l = jax.block_until_ready(fwd(x, params, K=K, pad=pad))

    assert out_h.shape == (N, Cout_h, H, W)
    assert out_m.shape == (N, Cout_m, H // 2, W // 2)
    assert out_l.shape == (N, Cout_l, H // 4, W // 4)

    # Cross-check against a plain-JAX reference with identical (bf16-input) numerics.
    ref_h = ref_conv_bn(x, params["w_h2h"], params["g_h"], params["b_h"], pad)
    ref_m = ref_conv_bn(maxpool_nchw(x, 2), params["w_h2m"], params["g_m"], params["b_m"], pad)
    ref_l = ref_conv_bn(maxpool_nchw(x, 4), params["w_h2l"], params["g_l"], params["b_l"], pad)
    for got, ref in ((out_h, ref_h), (out_m, ref_m), (out_l, ref_l)):
        err = float(jnp.max(jnp.abs(got - ref)))
        assert jnp.allclose(got, ref, atol=2e-3, rtol=2e-3), err

    print("KERNEL_OK")
</pallas_src>

<mosaic_0001>
module attributes {stable_mosaic.version = 11 : i64} {
  func.func @_stats_kernel(%arg0: i32, %arg1: memref<1x4x326xbf16, #tpu.memory_space<vmem>>, %arg2: memref<1x4x102xbf16, #tpu.memory_space<vmem>>, %arg3: memref<1x4x38xbf16, #tpu.memory_space<vmem>>, %arg4: memref<8x36xbf16, #tpu.memory_space<vmem>>, %arg5: memref<8x36xbf16, #tpu.memory_space<vmem>>, %arg6: memref<8x36xbf16, #tpu.memory_space<vmem>>, %arg7: memref<1x8x1xf32, #tpu.memory_space<vmem>>, %arg8: memref<1x8x1xf32, #tpu.memory_space<vmem>>, %arg9: memref<1x8x1xf32, #tpu.memory_space<vmem>>, %arg10: memref<1x8x1xf32, #tpu.memory_space<vmem>>, %arg11: memref<1x8x1xf32, #tpu.memory_space<vmem>>, %arg12: memref<1x8x1xf32, #tpu.memory_space<vmem>>) attributes {dimension_semantics = [#tpu.dimension_semantics<parallel>], iteration_bounds = array<i64: 2>, scalar_prefetch = 0 : i64, scratch_operands = 0 : i64, tpu.core_type = #tpu.core_type<tc>, window_params = [{transform_indices = @transform_0, window_bounds = array<i64: 1, 4, 326>}, {transform_indices = @transform_1, window_bounds = array<i64: 1, 4, 102>}, {transform_indices = @transform_2, window_bounds = array<i64: 1, 4, 38>}, {pipeline_mode = #tpu.pipeline_mode<synchronous>, transform_indices = @transform_3, window_bounds = array<i64: 8, 36>}, {pipeline_mode = #tpu.pipeline_mode<synchronous>, transform_indices = @transform_4, window_bounds = array<i64: 8, 36>}, {pipeline_mode = #tpu.pipeline_mode<synchronous>, transform_indices = @transform_5, window_bounds = array<i64: 8, 36>}, {transform_indices = @transform_6, window_bounds = array<i64: 1, 8, 1>}, {transform_indices = @transform_7, window_bounds = array<i64: 1, 8, 1>}, {transform_indices = @transform_8, window_bounds = array<i64: 1, 8, 1>}, {transform_indices = @transform_9, window_bounds = array<i64: 1, 8, 1>}, {transform_indices = @transform_10, window_bounds = array<i64: 1, 8, 1>}, {transform_indices = @transform_11, window_bounds = array<i64: 1, 8, 1>}]} {
    %c0 = arith.constant 0 : index
    %c0_0 = arith.constant 0 : index
    %c0_1 = arith.constant 0 : index
    %0 = vector.load %arg1[%c0, %c0_0, %c0_1] : memref<1x4x326xbf16, #tpu.memory_space<vmem>>, vector<1x4x288xbf16>
    %1 = vector.shape_cast %0 : vector<1x4x288xbf16> to vector<4x288xbf16>
    %2 = arith.extf %1 : vector<4x288xbf16> to vector<4x288xf32>
    %c0_2 = arith.constant 0 : index
    %c0_3 = arith.constant 0 : index
    %c1 = arith.constant 1 : index
    %3 = vector.load %arg1[%c0_2, %c0_3, %c1] : memref<1x4x326xbf16, #tpu.memory_space<vmem>>, vector<1x4x288xbf16>
    %4 = vector.shape_cast %3 : vector<1x4x288xbf16> to vector<4x288xbf16>
    %5 = arith.extf %4 : vector<4x288xbf16> to vector<4x288xf32>
    %c0_4 = arith.constant 0 : index
    %c0_5 = arith.constant 0 : index
    %c2 = arith.constant 2 : index
    %6 = vector.load %arg1[%c0_4, %c0_5, %c2] : memref<1x4x326xbf16, #tpu.memory_space<vmem>>, vector<1x4x288xbf16>
    %7 = vector.shape_cast %6 : vector<1x4x288xbf16> to vector<4x288xbf16>
    %8 = arith.extf %7 : vector<4x288xbf16> to vector<4x288xf32>
    %c0_6 = arith.constant 0 : index
    %c0_7 = arith.constant 0 : index
    %c18 = arith.constant 18 : index
    %9 = vector.load %arg1[%c0_6, %c0_7, %c18] : memref<1x4x326xbf16, #tpu.memory_space<vmem>>, vector<1x4x288xbf16>
    %10 = vector.shape_cast %9 : vector<1x4x288xbf16> to vector<4x288xbf16>
    %11 = arith.extf %10 : vector<4x288xbf16> to vector<4x288xf32>
    %c0_8 = arith.constant 0 : index
    %c0_9 = arith.constant 0 : index
    %c19 = arith.constant 19 : index
    %12 = vector.load %arg1[%c0_8, %c0_9, %c19] : memref<1x4x326xbf16, #tpu.memory_space<vmem>>, vector<1x4x288xbf16>
    %13 = vector.shape_cast %12 : vector<1x4x288xbf16> to vector<4x288xbf16>
    %14 = arith.extf %13 : vector<4x288xbf16> to vector<4x288xf32>
    %c0_10 = arith.constant 0 : index
    %c0_11 = arith.constant 0 : index
    %c20 = arith.constant 20 : index
    %15 = vector.load %arg1[%c0_10, %c0_11, %c20] : memref<1x4x326xbf16, #tpu.memory_space<vmem>>, vector<1x4x288xbf16>
    %16 = vector.shape_cast %15 : vector<1x4x288xbf16> to vector<4x288xbf16>
    %17 = arith.extf %16 : vector<4x288xbf16> to vector<4x288xf32>
    %c0_12 = arith.constant 0 : index
    %c0_13 = arith.constant 0 : index
    %c36 = arith.constant 36 : index
    %18 = vector.load %arg1[%c0_12, %c0_13, %c36] : memref<1x4x326xbf16, #tpu.memory_space<vmem>>, vector<1x4x288xbf16>
    %19 = vector.shape_cast %18 : vector<1x4x288xbf16> to vector<4x288xbf16>
    %20 = arith.extf %19 : vector<4x288xbf16> to vector<4x288xf32>
    %c0_14 = arith.constant 0 : index
    %c0_15 = arith.constant 0 : index
    %c37 = arith.constant 37 : index
    %21 = vector.load %arg1[%c0_14, %c0_15, %c37] : memref<1x4x326xbf16, #tpu.memory_space<vmem>>, vector<1x4x288xbf16>
    %22 = vector.shape_cast %21 : vector<1x4x288xbf16> to vector<4x288xbf16>
    %23 = arith.extf %22 : vector<4x288xbf16> to vector<4x288xf32>
    %c0_16 = arith.constant 0 : index
    %c0_17 = arith.constant 0 : index
    %c38 = arith.constant 38 : index
    %24 = vector.load %arg1[%c0_16, %c0_17, %c38] : memref<1x4x326xbf16, #tpu.memory_space<vmem>>, vector<1x4x288xbf16>
    %25 = vector.shape_cast %24 : vector<1x4x288xbf16> to vector<4x288xbf16>
    %26 = arith.extf %25 : vector<4x288xbf16> to vector<4x288xf32>
    %27 = tpu.concatenate %2, %5, %8, %11, %14, %17, %20, %23, %26 in 0 : vector<4x288xf32>, vector<4x288xf32>, vector<4x288xf32>, vector<4x288xf32>, vector<4x288xf32>, vector<4x288xf32>, vector<4x288xf32>, vector<4x288xf32>, vector<4x288xf32> -> vector<36x288xf32>
    %28 = arith.truncf %27 : vector<36x288xf32> to vector<36x288xbf16>
    %c0_18 = arith.constant 0 : index
    %c0_19 = arith.constant 0 : index
    %29 = vector.load %arg4[%c0_18, %c0_19] : memref<8x36xbf16, #tpu.memory_space<vmem>>, vector<8x36xbf16>
    %cst = arith.constant dense<0.000000e+00> : vector<8x288xf32>
    %30 = tpu.matmul %29, %28, %cst {dimension_numbers = #tpu.dot_dimension_numbers<[1], [0], [0], [1], [0, 0, 1, 1], [], []>} : vector<8x36xbf16>, vector<36x288xbf16>, vector<8x288xf32> -> vector<8x288xf32>
    %31 = tpu.iota {dimensions = array<i32: 1>} : vector<1x288xi32>
    %c18_i32 = arith.constant 18 : i32
    %c0_i32 = arith.constant 0 : i32
    %32 = arith.cmpi eq, %c18_i32, %c0_i32 : i32
    %c1_i32 = arith.constant 1 : i32
    %33 = arith.select %32, %c1_i32, %c18_i32 : i32
    %34 = vector.broadcast %33 : i32 to vector<1x288xi32>
    %35 = arith.remsi %31, %34 : vector<1x288xi32>
    %c0_i32_20 = arith.constant 0 : i32
    %36 = vector.broadcast %c0_i32_20 : i32 to vector<1x288xi32>
    %37 = arith.cmpi ne, %35, %36 : vector<1x288xi32>
    %c0_i32_21 = arith.constant 0 : i32
    %38 = vector.broadcast %c0_i32_21 : i32 to vector<1x288xi32>
    %39 = arith.cmpi slt, %35, %38 : vector<1x288xi32>
    %c0_i32_22 = arith.constant 0 : i32
    %40 = arith.cmpi slt, %33, %c0_i32_22 : i32
    %41 = vector.broadcast %40 : i1 to vector<1x288xi1>
    %42 = vector.broadcast %41 : vector<1x288xi1> to vector<1x288xi1>
    %43 = arith.xori %39, %42 : vector<1x288xi1>
    %44 = arith.andi %43, %37 : vector<1x288xi1>
    %45 = vector.broadcast %33 : i32 to vector<1x288xi32>
    %46 = arith.addi %35, %45 : vector<1x288xi32>
    %47 = arith.select %44, %46, %35 : vector<1x288xi1>, vector<1x288xi32>
    %c16_i32 = arith.constant 16 : i32
    %48 = vector.broadcast %c16_i32 : i32 to vector<1x288xi32>
    %49 = arith.cmpi slt, %47, %48 : vector<1x288xi32>
    %cst_23 = arith.constant 0.000000e+00 : f32
    %50 = vector.shape_cast %49 : vector<1x288xi1> to vector<1x288xi1>
    %51 = vector.broadcast %50 : vector<1x288xi1> to vector<8x288xi1>
    %52 = vector.broadcast %cst_23 : f32 to vector<8x288xf32>
    %53 = arith.select %51, %30, %52 : vector<8x288xi1>, vector<8x288xf32>
    %cst_24 = arith.constant dense<0.000000e+00> : vector<8xf32>
    %54 = vector.multi_reduction <add>, %53, %cst_24 [1] : vector<8x288xf32> to vector<8xf32>
    %55 = vector.shape_cast %54 : vector<8xf32> to vector<8x1xf32>
    %c0_25 = arith.constant 0 : index
    %c0_26 = arith.constant 0 : index
    %c0_27 = arith.constant 0 : index
    %56 = vector.load %arg7[%c0_25, %c0_26, %c0_27] : memref<1x8x1xf32, #tpu.memory_space<vmem>>, vector<1x8x1xf32>
    %57 = vector.shape_cast %56 : vector<1x8x1xf32> to vector<8x1xf32>
    %58 = vector.shape_cast %55 : vector<8x1xf32> to vector<1x8x1xf32>
    tpu.vector_store %arg7[%c0_25, %c0_26, %c0_27], %58 {strides = array<i32>} : memref<1x8x1xf32, #tpu.memory_space<vmem>>, vector<1x8x1xf32>,
    %59 = arith.mulf %53, %53 : vector<8x288xf32>
    %cst_28 = arith.constant dense<0.000000e+00> : vector<8xf32>
    %60 = vector.multi_reduction <add>, %59, %cst_28 [1] : vector<8x288xf32> to vector<8xf32>
    %61 = vector.shape_cast %60 : vector<8xf32> to vector<8x1xf32>
    %c0_29 = arith.constant 0 : index
    %c0_30 = arith.constant 0 : index
    %c0_31 = arith.constant 0 : index
    %62 = vector.load %arg8[%c0_29, %c0_30, %c0_31] : memref<1x8x1xf32, #tpu.memory_space<vmem>>, vector<1x8x1xf32>
    %63 = vector.shape_cast %62 : vector<1x8x1xf32> to vector<8x1xf32>
    %64 = vector.shape_cast %61 : vector<8x1xf32> to vector<1x8x1xf32>
    tpu.vector_store %arg8[%c0_29, %c0_30, %c0_31], %64 {strides = array<i32>} : memref<1x8x1xf32, #tpu.memory_space<vmem>>, vector<1x8x1xf32>,
    %c0_32 = arith.constant 0 : index
    %c0_33 = arith.constant 0 : index
    %c0_34 = arith.constant 0 : index
    %65 = vector.load %arg2[%c0_32, %c0_33, %c0_34] : memref<1x4x102xbf16, #tpu.memory_space<vmem>>, vector<1x4x80xbf16>
    %66 = vector.shape_cast %65 : vector<1x4x80xbf16> to vector<4x80xbf16>
    %67 = arith.extf %66 : vector<4x80xbf16> to vector<4x80xf32>
    %c0_35 = arith.constant 0 : index
    %c0_36 = arith.constant 0 : index
    %c1_37 = arith.constant 1 : index
    %68 = vector.load %arg2[%c0_35, %c0_36, %c1_37] : memref<1x4x102xbf16, #tpu.memory_space<vmem>>, vector<1x4x80xbf16>
    %69 = vector.shape_cast %68 : vector<1x4x80xbf16> to vector<4x80xbf16>
    %70 = arith.extf %69 : vector<4x80xbf16> to vector<4x80xf32>
    %c0_38 = arith.constant 0 : index
    %c0_39 = arith.constant 0 : index
    %c2_40 = arith.constant 2 : index
    %71 = vector.load %arg2[%c0_38, %c0_39, %c2_40] : memref<1x4x102xbf16, #tpu.memory_space<vmem>>, vector<1x4x80xbf16>
    %72 = vector.shape_cast %71 : vector<1x4x80xbf16> to vector<4x80xbf16>
    %73 = arith.extf %72 : vector<4x80xbf16> to vector<4x80xf32>
    %c0_41 = arith.constant 0 : index
    %c0_42 = arith.constant 0 : index
    %c10 = arith.constant 10 : index
    %74 = vector.load %arg2[%c0_41, %c0_42, %c10] : memref<1x4x102xbf16, #tpu.memory_space<vmem>>, vector<1x4x80xbf16>
    %75 = vector.shape_cast %74 : vector<1x4x80xbf16> to vector<4x80xbf16>
    %76 = arith.extf %75 : vector<4x80xbf16> to vector<4x80xf32>
    %c0_43 = arith.constant 0 : index
    %c0_44 = arith.constant 0 : index
    %c11 = arith.constant 11 : index
    %77 = vector.load %arg2[%c0_43, %c0_44, %c11] : memref<1x4x102xbf16, #tpu.memory_space<vmem>>, vector<1x4x80xbf16>
    %78 = vector.shape_cast %77 : vector<1x4x80xbf16> to vector<4x80xbf16>
    %79 = arith.extf %78 : vector<4x80xbf16> to vector<4x80xf32>
    %c0_45 = arith.constant 0 : index
    %c0_46 = arith.constant 0 : index
    %c12 = arith.constant 12 : index
    %80 = vector.load %arg2[%c0_45, %c0_46, %c12] : memref<1x4x102xbf16, #tpu.memory_space<vmem>>, vector<1x4x80xbf16>
    %81 = vector.shape_cast %80 : vector<1x4x80xbf16> to vector<4x80xbf16>
    %82 = arith.extf %81 : vector<4x80xbf16> to vector<4x80xf32>
    %c0_47 = arith.constant 0 : index
    %c0_48 = arith.constant 0 : index
    %c20_49 = arith.constant 20 : index
    %83 = vector.load %arg2[%c0_47, %c0_48, %c20_49] : memref<1x4x102xbf16, #tpu.memory_space<vmem>>, vector<1x4x80xbf16>
    %84 = vector.shape_cast %83 : vector<1x4x80xbf16> to vector<4x80xbf16>
    %85 = arith.extf %84 : vector<4x80xbf16> to vector<4x80xf32>
    %c0_50 = arith.constant 0 : index
    %c0_51 = arith.constant 0 : index
    %c21 = arith.constant 21 : index
    %86 = vector.load %arg2[%c0_50, %c0_51, %c21] : memref<1x4x102xbf16, #tpu.memory_space<vmem>>, vector<1x4x80xbf16>
    %87 = vector.shape_cast %86 : vector<1x4x80xbf16> to vector<4x80xbf16>
    %88 = arith.extf %87 : vector<4x80xbf16> to vector<4x80xf32>
    %c0_52 = arith.constant 0 : index
    %c0_53 = arith.constant 0 : index
    %c22 = arith.constant 22 : index
    %89 = vector.load %arg2[%c0_52, %c0_53, %c22] : memref<1x4x102xbf16, #tpu.memory_space<vmem>>, vector<1x4x80xbf16>
    %90 = vector.shape_cast %89 : vector<1x4x80xbf16> to vector<4x80xbf16>
    %91 = arith.extf %90 : vector<4x80xbf16> to vector<4x80xf32>
    %92 = tpu.concatenate %67, %70, %73, %76, %79, %82, %85, %88, %91 in 0 : vector<4x80xf32>, vector<4x80xf32>, vector<4x80xf32>, vector<4x80xf32>, vector<4x80xf32>, vector<4x80xf32>, vector<4x80xf32>, vector<4x80xf32>, vector<4x80xf32> -> vector<36x80xf32>
    %93 = arith.truncf %92 : vector<36x80xf32> to vector<36x80xbf16>
    %c0_54 = arith.constant 0 : index
    %c0_55 = arith.constant 0 : index
    %94 = vector.load %arg5[%c0_54, %c0_55] : memref<8x36xbf16, #tpu.memory_space<vmem>>, vector<8x36xbf16>
    %cst_56 = arith.constant dense<0.000000e+00> : vector<8x80xf32>
    %95 = tpu.matmul %94, %93, %cst_56 {dimension_numbers = #tpu.dot_dimension_numbers<[1], [0], [0], [1], [0, 0, 1, 1], [], []>} : vector<8x36xbf16>, vector<36x80xbf16>, vector<8x80xf32> -> vector<8x80xf32>
    %96 = tpu.iota {dimensions = array<i32: 1>} : vector<1x80xi32>
    %c10_i32 = arith.constant 10 : i32
    %c0_i32_57 = arith.constant 0 : i32
    %97 = arith.cmpi eq, %c10_i32, %c0_i32_57 : i32
    %c1_i32_58 = arith.constant 1 : i32
    %98 = arith.select %97, %c1_i32_58, %c10_i32 : i32
    %99 = vector.broadcast %98 : i32 to vector<1x80xi32>
    %100 = arith.remsi %96, %99 : vector<1x80xi32>
    %c0_i32_59 = arith.constant 0 : i32
    %101 = vector.broadcast %c0_i32_59 : i32 to vector<1x80xi32>
    %102 = arith.cmpi ne, %100, %101 : vector<1x80xi32>
    %c0_i32_60 = arith.constant 0 : i32
    %103 = vector.broadcast %c0_i32_60 : i32 to vector<1x80xi32>
    %104 = arith.cmpi slt, %100, %103 : vector<1x80xi32>
    %c0_i32_61 = arith.constant 0 : i32
    %105 = arith.cmpi slt, %98, %c0_i32_61 : i32
    %106 = vector.broadcast %105 : i1 to vector<1x80xi1>
    %107 = vector.broadcast %106 : vector<1x80xi1> to vector<1x80xi1>
    %108 = arith.xori %104, %107 : vector<1x80xi1>
    %109 = arith.andi %108, %102 : vector<1x80xi1>
    %110 = vector.broadcast %98 : i32 to vector<1x80xi32>
    %111 = arith.addi %100, %110 : vector<1x80xi32>
    %112 = arith.select %109, %111, %100 : vector<1x80xi1>, vector<1x80xi32>
    %c8_i32 = arith.constant 8 : i32
    %113 = vector.broadcast %c8_i32 : i32 to vector<1x80xi32>
    %114 = arith.cmpi slt, %112, %113 : vector<1x80xi32>
    %cst_62 = arith.constant 0.000000e+00 : f32
    %115 = vector.shape_cast %114 : vector<1x80xi1> to vector<1x80xi1>
    %116 = vector.broadcast %115 : vector<1x80xi1> to vector<8x80xi1>
    %117 = vector.broadcast %cst_62 : f32 to vector<8x80xf32>
    %118 = arith.select %116, %95, %117 : vector<8x80xi1>, vector<8x80xf32>
    %cst_63 = arith.constant dense<0.000000e+00> : vector<8xf32>
    %119 = vector.multi_reduction <add>, %118, %cst_63 [1] : vector<8x80xf32> to vector<8xf32>
    %120 = vector.shape_cast %119 : vector<8xf32> to vector<8x1xf32>
    %c0_64 = arith.constant 0 : index
    %c0_65 = arith.constant 0 : index
    %c0_66 = arith.constant 0 : index
    %121 = vector.load %arg9[%c0_64, %c0_65, %c0_66] : memref<1x8x1xf32, #tpu.memory_space<vmem>>, vector<1x8x1xf32>
    %122 = vector.shape_cast %121 : vector<1x8x1xf32> to vector<8x1xf32>
    %123 = vector.shape_cast %120 : vector<8x1xf32> to vector<1x8x1xf32>
    tpu.vector_store %arg9[%c0_64, %c0_65, %c0_66], %123 {strides = array<i32>} : memref<1x8x1xf32, #tpu.memory_space<vmem>>, vector<1x8x1xf32>,
    %124 = arith.mulf %118, %118 : vector<8x80xf32>
    %cst_67 = arith.constant dense<0.000000e+00> : vector<8xf32>
    %125 = vector.multi_reduction <add>, %124, %cst_67 [1] : vector<8x80xf32> to vector<8xf32>
    %126 = vector.shape_cast %125 : vector<8xf32> to vector<8x1xf32>
    %c0_68 = arith.constant 0 : index
    %c0_69 = arith.constant 0 : index
    %c0_70 = arith.constant 0 : index
    %127 = vector.load %arg10[%c0_68, %c0_69, %c0_70] : memref<1x8x1xf32, #tpu.memory_space<vmem>>, vector<1x8x1xf32>
    %128 = vector.shape_cast %127 : vector<1x8x1xf32> to vector<8x1xf32>
    %129 = vector.shape_cast %126 : vector<8x1xf32> to vector<1x8x1xf32>
    tpu.vector_store %arg10[%c0_68, %c0_69, %c0_70], %129 {strides = array<i32>} : memref<1x8x1xf32, #tpu.memory_space<vmem>>, vector<1x8x1xf32>,
    %c0_71 = arith.constant 0 : index
    %c0_72 = arith.constant 0 : index
    %c0_73 = arith.constant 0 : index
    %130 = vector.load %arg3[%c0_71, %c0_72, %c0_73] : memref<1x4x38xbf16, #tpu.memory_space<vmem>>, vector<1x4x24xbf16>
    %131 = vector.shape_cast %130 : vector<1x4x24xbf16> to vector<4x24xbf16>
    %132 = arith.extf %131 : vector<4x24xbf16> to vector<4x24xf32>
    %c0_74 = arith.constant 0 : index
    %c0_75 = arith.constant 0 : index
    %c1_76 = arith.constant 1 : index
    %133 = vector.load %arg3[%c0_74, %c0_75, %c1_76] : memref<1x4x38xbf16, #tpu.memory_space<vmem>>, vector<1x4x24xbf16>
    %134 = vector.shape_cast %133 : vector<1x4x24xbf16> to vector<4x24xbf16>
    %135 = arith.extf %134 : vector<4x24xbf16> to vector<4x24xf32>
    %c0_77 = arith.constant 0 : index
    %c0_78 = arith.constant 0 : index
    %c2_79 = arith.constant 2 : index
    %136 = vector.load %arg3[%c0_77, %c0_78, %c2_79] : memref<1x4x38xbf16, #tpu.memory_space<vmem>>, vector<1x4x24xbf16>
    %137 = vector.shape_cast %136 : vector<1x4x24xbf16> to vector<4x24xbf16>
    %138 = arith.extf %137 : vector<4x24xbf16> to vector<4x24xf32>
    %c0_80 = arith.constant 0 : index
    %c0_81 = arith.constant 0 : index
    %c6 = arith.constant 6 : index
    %139 = vector.load %arg3[%c0_80, %c0_81, %c6] : memref<1x4x38xbf16, #tpu.memory_space<vmem>>, vector<1x4x24xbf16>
    %140 = vector.shape_cast %139 : vector<1x4x24xbf16> to vector<4x24xbf16>
    %141 = arith.extf %140 : vector<4x24xbf16> to vector<4x24xf32>
    %c0_82 = arith.constant 0 : index
    %c0_83 = arith.constant 0 : index
    %c7 = arith.constant 7 : index
    %142 = vector.load %arg3[%c0_82, %c0_83, %c7] : memref<1x4x38xbf16, #tpu.memory_space<vmem>>, vector<1x4x24xbf16>
    %143 = vector.shape_cast %142 : vector<1x4x24xbf16> to vector<4x24xbf16>
    %144 = arith.extf %143 : vector<4x24xbf16> to vector<4x24xf32>
    %c0_84 = arith.constant 0 : index
    %c0_85 = arith.constant 0 : index
    %c8 = arith.constant 8 : index
    %145 = vector.load %arg3[%c0_84, %c0_85, %c8] : memref<1x4x38xbf16, #tpu.memory_space<vmem>>, vector<1x4x24xbf16>
    %146 = vector.shape_cast %145 : vector<1x4x24xbf16> to vector<4x24xbf16>
    %147 = arith.extf %146 : vector<4x24xbf16> to vector<4x24xf32>
    %c0_86 = arith.constant 0 : index
    %c0_87 = arith.constant 0 : index
    %c12_88 = arith.constant 12 : index
    %148 = vector.load %arg3[%c0_86, %c0_87, %c12_88] : memref<1x4x38xbf16, #tpu.memory_space<vmem>>, vector<1x4x24xbf16>
    %149 = vector.shape_cast %148 : vector<1x4x24xbf16> to vector<4x24xbf16>
    %150 = arith.extf %149 : vector<4x24xbf16> to vector<4x24xf32>
    %c0_89 = arith.constant 0 : index
    %c0_90 = arith.constant 0 : index
    %c13 = arith.constant 13 : index
    %151 = vector.load %arg3[%c0_89, %c0_90, %c13] : memref<1x4x38xbf16, #tpu.memory_space<vmem>>, vector<1x4x24xbf16>
    %152 = vector.shape_cast %151 : vector<1x4x24xbf16> to vector<4x24xbf16>
    %153 = arith.extf %152 : vector<4x24xbf16> to vector<4x24xf32>
    %c0_91 = arith.constant 0 : index
    %c0_92 = arith.constant 0 : index
    %c14 = arith.constant 14 : index
    %154 = vector.load %arg3[%c0_91, %c0_92, %c14] : memref<1x4x38xbf16, #tpu.memory_space<vmem>>, vector<1x4x24xbf16>
    %155 = vector.shape_cast %154 : vector<1x4x24xbf16> to vector<4x24xbf16>
    %156 = arith.extf %155 : vector<4x24xbf16> to vector<4x24xf32>
    %157 = tpu.concatenate %132, %135, %138, %141, %144, %147, %150, %153, %156 in 0 : vector<4x24xf32>, vector<4x24xf32>, vector<4x24xf32>, vector<4x24xf32>, vector<4x24xf32>, vector<4x24xf32>, vector<4x24xf32>, vector<4x24xf32>, vector<4x24xf32> -> vector<36x24xf32>
    %158 = arith.truncf %157 : vector<36x24xf32> to vector<36x24xbf16>
    %c0_93 = arith.constant 0 : index
    %c0_94 = arith.constant 0 : index
    %159 = vector.load %arg6[%c0_93, %c0_94] : memref<8x36xbf16, #tpu.memory_space<vmem>>, vector<8x36xbf16>
    %cst_95 = arith.constant dense<0.000000e+00> : vector<8x24xf32>
    %160 = tpu.matmul %159, %158, %cst_95 {dimension_numbers = #tpu.dot_dimension_numbers<[1], [0], [0], [1], [0, 0, 1, 1], [], []>} : vector<8x36xbf16>, vector<36x24xbf16>, vector<8x24xf32> -> vector<8x24xf32>
    %161 = tpu.iota {dimensions = array<i32: 1>} : vector<1x24xi32>
    %c6_i32 = arith.constant 6 : i32
    %c0_i32_96 = arith.constant 0 : i32
    %162 = arith.cmpi eq, %c6_i32, %c0_i32_96 : i32
    %c1_i32_97 = arith.constant 1 : i32
    %163 = arith.select %162, %c1_i32_97, %c6_i32 : i32
    %164 = vector.broadcast %163 : i32 to vector<1x24xi32>
    %165 = arith.remsi %161, %164 : vector<1x24xi32>
    %c0_i32_98 = arith.constant 0 : i32
    %166 = vector.broadcast %c0_i32_98 : i32 to vector<1x24xi32>
    %167 = arith.cmpi ne, %165, %166 : vector<1x24xi32>
    %c0_i32_99 = arith.constant 0 : i32
    %168 = vector.broadcast %c0_i32_99 : i32 to vector<1x24xi32>
    %169 = arith.cmpi slt, %165, %168 : vector<1x24xi32>
    %c0_i32_100 = arith.constant 0 : i32
    %170 = arith.cmpi slt, %163, %c0_i32_100 : i32
    %171 = vector.broadcast %170 : i1 to vector<1x24xi1>
    %172 = vector.broadcast %171 : vector<1x24xi1> to vector<1x24xi1>
    %173 = arith.xori %169, %172 : vector<1x24xi1>
    %174 = arith.andi %173, %167 : vector<1x24xi1>
    %175 = vector.broadcast %163 : i32 to vector<1x24xi32>
    %176 = arith.addi %165, %175 : vector<1x24xi32>
    %177 = arith.select %174, %176, %165 : vector<1x24xi1>, vector<1x24xi32>
    %c4_i32 = arith.constant 4 : i32
    %178 = vector.broadcast %c4_i32 : i32 to vector<1x24xi32>
    %179 = arith.cmpi slt, %177, %178 : vector<1x24xi32>
    %cst_101 = arith.constant 0.000000e+00 : f32
    %180 = vector.shape_cast %179 : vector<1x24xi1> to vector<1x24xi1>
    %181 = vector.broadcast %180 : vector<1x24xi1> to vector<8x24xi1>
    %182 = vector.broadcast %cst_101 : f32 to vector<8x24xf32>
    %183 = arith.select %181, %160, %182 : vector<8x24xi1>, vector<8x24xf32>
    %cst_102 = arith.constant dense<0.000000e+00> : vector<8xf32>
    %184 = vector.multi_reduction <add>, %183, %cst_102 [1] : vector<8x24xf32> to vector<8xf32>
    %185 = vector.shape_cast %184 : vector<8xf32> to vector<8x1xf32>
    %c0_103 = arith.constant 0 : index
    %c0_104 = arith.constant 0 : index
    %c0_105 = arith.constant 0 : index
    %186 = vector.load %arg11[%c0_103, %c0_104, %c0_105] : memref<1x8x1xf32, #tpu.memory_space<vmem>>, vector<1x8x1xf32>
    %187 = vector.shape_cast %186 : vector<1x8x1xf32> to vector<8x1xf32>
    %188 = vector.shape_cast %185 : vector<8x1xf32> to vector<1x8x1xf32>
    tpu.vector_store %arg11[%c0_103, %c0_104, %c0_105], %188 {strides = array<i32>} : memref<1x8x1xf32, #tpu.memory_space<vmem>>, vector<1x8x1xf32>,
    %189 = arith.mulf %183, %183 : vector<8x24xf32>
    %cst_106 = arith.constant dense<0.000000e+00> : vector<8xf32>
    %190 = vector.multi_reduction <add>, %189, %cst_106 [1] : vector<8x24xf32> to vector<8xf32>
    %191 = vector.shape_cast %190 : vector<8xf32> to vector<8x1xf32>
    %c0_107 = arith.constant 0 : index
    %c0_108 = arith.constant 0 : index
    %c0_109 = arith.constant 0 : index
    %192 = vector.load %arg12[%c0_107, %c0_108, %c0_109] : memref<1x8x1xf32, #tpu.memory_space<vmem>>, vector<1x8x1xf32>
    %193 = vector.shape_cast %192 : vector<1x8x1xf32> to vector<8x1xf32>
    %194 = vector.shape_cast %191 : vector<8x1xf32> to vector<1x8x1xf32>
    tpu.vector_store %arg12[%c0_107, %c0_108, %c0_109], %194 {strides = array<i32>} : memref<1x8x1xf32, #tpu.memory_space<vmem>>, vector<1x8x1xf32>,
    return
  }
  func.func @transform_0(%arg0: i32) -> (i32, i32, i32) {
    %c0_i32 = arith.constant 0 : i32
    %c0_i32_0 = arith.constant 0 : i32
    %c0_i32_1 = arith.constant 0 : i32
    return %arg0, %c0_i32, %c0_i32_0 : i32, i32, i32
  }
  func.func @transform_1(%arg0: i32) -> (i32, i32, i32) {
    %c0_i32 = arith.constant 0 : i32
    %c0_i32_0 = arith.constant 0 : i32
    %c0_i32_1 = arith.constant 0 : i32
    return %arg0, %c0_i32, %c0_i32_0 : i32, i32, i32
  }
  func.func @transform_2(%arg0: i32) -> (i32, i32, i32) {
    %c0_i32 = arith.constant 0 : i32
    %c0_i32_0 = arith.constant 0 : i32
    %c0_i32_1 = arith.constant 0 : i32
    return %arg0, %c0_i32, %c0_i32_0 : i32, i32, i32
  }
  func.func @transform_3(%arg0: i32) -> (i32, i32) {
    %c0_i32 = arith.constant 0 : i32
    %c0_i32_0 = arith.constant 0 : i32
    %c0_i32_1 = arith.constant 0 : i32
    return %c0_i32, %c0_i32_0 : i32, i32
  }
  func.func @transform_4(%arg0: i32) -> (i32, i32) {
    %c0_i32 = arith.constant 0 : i32
    %c0_i32_0 = arith.constant 0 : i32
    %c0_i32_1 = arith.constant 0 : i32
    return %c0_i32, %c0_i32_0 : i32, i32
  }
  func.func @transform_5(%arg0: i32) -> (i32, i32) {
    %c0_i32 = arith.constant 0 : i32
    %c0_i32_0 = arith.constant 0 : i32
    %c0_i32_1 = arith.constant 0 : i32
    return %c0_i32, %c0_i32_0 : i32, i32
  }
  func.func @transform_6(%arg0: i32) -> (i32, i32, i32) {
    %c0_i32 = arith.constant 0 : i32
    %c0_i32_0 = arith.constant 0 : i32
    %c0_i32_1 = arith.constant 0 : i32
    return %arg0, %c0_i32, %c0_i32_0 : i32, i32, i32
  }
  func.func @transform_7(%arg0: i32) -> (i32, i32, i32) {
    %c0_i32 = arith.constant 0 : i32
    %c0_i32_0 = arith.constant 0 : i32
    %c0_i32_1 = arith.constant 0 : i32
    return %arg0, %c0_i32, %c0_i32_0 : i32, i32, i32
  }
  func.func @transform_8(%arg0: i32) -> (i32, i32, i32) {
    %c0_i32 = arith.constant 0 : i32
    %c0_i32_0 = arith.constant 0 : i32
    %c0_i32_1 = arith.constant 0 : i32
    return %arg0, %c0_i32, %c0_i32_0 : i32, i32, i32
  }
  func.func @transform_9(%arg0: i32) -> (i32, i32, i32) {
    %c0_i32 = arith.constant 0 : i32
    %c0_i32_0 = arith.constant 0 : i32
    %c0_i32_1 = arith.constant 0 : i32
    return %arg0, %c0_i32, %c0_i32_0 : i32, i32, i32
  }
  func.func @transform_10(%arg0: i32) -> (i32, i32, i32) {
    %c0_i32 = arith.constant 0 : i32
    %c0_i32_0 = arith.constant 0 : i32
    %c0_i32_1 = arith.constant 0 : i32
    return %arg0, %c0_i32, %c0_i32_0 : i32, i32, i32
  }
  func.func @transform_11(%arg0: i32) -> (i32, i32, i32) {
    %c0_i32 = arith.constant 0 : i32
    %c0_i32_0 = arith.constant 0 : i32
    %c0_i32_1 = arith.constant 0 : i32
    return %arg0, %c0_i32, %c0_i32_0 : i32, i32, i32
  }
}

module attributes {stable_mosaic.version = 11 : i64} {
  func.func @_apply_kernel(%arg0: i32, %arg1: memref<1x4x326xbf16, #tpu.memory_space<vmem>>, %arg2: memref<1x4x102xbf16, #tpu.memory_space<vmem>>, %arg3: memref<1x4x38xbf16, #tpu.memory_space<vmem>>, %arg4: memref<8x36xbf16, #tpu.memory_space<vmem>>, %arg5: memref<8x36xbf16, #tpu.memory_space<vmem>>, %arg6: memref<8x36xbf16, #tpu.memory_space<vmem>>, %arg7: memref<8x1xf32, #tpu.memory_space<vmem>>, %arg8: memref<8x1xf32, #tpu.memory_space<vmem>>, %arg9: memref<8x1xf32, #tpu.memory_space<vmem>>, %arg10: memref<8x1xf32, #tpu.memory_space<vmem>>, %arg11: memref<8x1xf32, #tpu.memory_space<vmem>>, %arg12: memref<8x1xf32, #tpu.memory_space<vmem>>, %arg13: memref<1x4x288xf32, #tpu.memory_space<vmem>>, %arg14: memref<1x2x80xf32, #tpu.memory_space<vmem>>, %arg15: memref<1x2x24xf32, #tpu.memory_space<vmem>>) attributes {dimension_semantics = [#tpu.dimension_semantics<parallel>], iteration_bounds = array<i64: 2>, scalar_prefetch = 0 : i64, scratch_operands = 0 : i64, tpu.core_type = #tpu.core_type<tc>, window_params = [{transform_indices = @transform_0, window_bounds = array<i64: 1, 4, 326>}, {transform_indices = @transform_1, window_bounds = array<i64: 1, 4, 102>}, {transform_indices = @transform_2, window_bounds = array<i64: 1, 4, 38>}, {pipeline_mode = #tpu.pipeline_mode<synchronous>, transform_indices = @transform_3, window_bounds = array<i64: 8, 36>}, {pipeline_mode = #tpu.pipeline_mode<synchronous>, transform_indices = @transform_4, window_bounds = array<i64: 8, 36>}, {pipeline_mode = #tpu.pipeline_mode<synchronous>, transform_indices = @transform_5, window_bounds = array<i64: 8, 36>}, {pipeline_mode = #tpu.pipeline_mode<synchronous>, transform_indices = @transform_6, window_bounds = array<i64: 8, 1>}, {pipeline_mode = #tpu.pipeline_mode<synchronous>, transform_indices = @transform_7, window_bounds = array<i64: 8, 1>}, {pipeline_mode = #tpu.pipeline_mode<synchronous>, transform_indices = @transform_8, window_bounds = array<i64: 8, 1>}, {pipeline_mode = #tpu.pipeline_mode<synchronous>, transform_indices = @transform_9, window_bounds = array<i64: 8, 1>}, {pipeline_mode = #tpu.pipeline_mode<synchronous>, transform_indices = @transform_10, window_bounds = array<i64: 8, 1>}, {pipeline_mode = #tpu.pipeline_mode<synchronous>, transform_indices = @transform_11, window_bounds = array<i64: 8, 1>}, {transform_indices = @transform_12, window_bounds = array<i64: 1, 4, 288>}, {transform_indices = @transform_13, window_bounds = array<i64: 1, 2, 80>}, {transform_indices = @transform_14, window_bounds = array<i64: 1, 2, 24>}]} {
    %c0 = arith.constant 0 : index
    %c0_0 = arith.constant 0 : index
    %c0_1 = arith.constant 0 : index
    %0 = vector.load %arg1[%c0, %c0_0, %c0_1] : memref<1x4x326xbf16, #tpu.memory_space<vmem>>, vector<1x4x288xbf16>
    %1 = vector.shape_cast %0 : vector<1x4x288xbf16> to vector<4x288xbf16>
    %2 = arith.extf %1 : vector<4x288xbf16> to vector<4x288xf32>
    %c0_2 = arith.constant 0 : index
    %c0_3 = arith.constant 0 : index
    %c1 = arith.constant 1 : index
    %3 = vector.load %arg1[%c0_2, %c0_3, %c1] : memref<1x4x326xbf16, #tpu.memory_space<vmem>>, vector<1x4x288xbf16>
    %4 = vector.shape_cast %3 : vector<1x4x288xbf16> to vector<4x288xbf16>
    %5 = arith.extf %4 : vector<4x288xbf16> to vector<4x288xf32>
    %c0_4 = arith.constant 0 : index
    %c0_5 = arith.constant 0 : index
    %c2 = arith.constant 2 : index
    %6 = vector.load %arg1[%c0_4, %c0_5, %c2] : memref<1x4x326xbf16, #tpu.memory_space<vmem>>, vector<1x4x288xbf16>
    %7 = vector.shape_cast %6 : vector<1x4x288xbf16> to vector<4x288xbf16>
    %8 = arith.extf %7 : vector<4x288xbf16> to vector<4x288xf32>
    %c0_6 = arith.constant 0 : index
    %c0_7 = arith.constant 0 : index
    %c18 = arith.constant 18 : index
    %9 = vector.load %arg1[%c0_6, %c0_7, %c18] : memref<1x4x326xbf16, #tpu.memory_space<vmem>>, vector<1x4x288xbf16>
    %10 = vector.shape_cast %9 : vector<1x4x288xbf16> to vector<4x288xbf16>
    %11 = arith.extf %10 : vector<4x288xbf16> to vector<4x288xf32>
    %c0_8 = arith.constant 0 : index
    %c0_9 = arith.constant 0 : index
    %c19 = arith.constant 19 : index
    %12 = vector.load %arg1[%c0_8, %c0_9, %c19] : memref<1x4x326xbf16, #tpu.memory_space<vmem>>, vector<1x4x288xbf16>
    %13 = vector.shape_cast %12 : vector<1x4x288xbf16> to vector<4x288xbf16>
    %14 = arith.extf %13 : vector<4x288xbf16> to vector<4x288xf32>
    %c0_10 = arith.constant 0 : index
    %c0_11 = arith.constant 0 : index
    %c20 = arith.constant 20 : index
    %15 = vector.load %arg1[%c0_10, %c0_11, %c20] : memref<1x4x326xbf16, #tpu.memory_space<vmem>>, vector<1x4x288xbf16>
    %16 = vector.shape_cast %15 : vector<1x4x288xbf16> to vector<4x288xbf16>
    %17 = arith.extf %16 : vector<4x288xbf16> to vector<4x288xf32>
    %c0_12 = arith.constant 0 : index
    %c0_13 = arith.constant 0 : index
    %c36 = arith.constant 36 : index
    %18 = vector.load %arg1[%c0_12, %c0_13, %c36] : memref<1x4x326xbf16, #tpu.memory_space<vmem>>, vector<1x4x288xbf16>
    %19 = vector.shape_cast %18 : vector<1x4x288xbf16> to vector<4x288xbf16>
    %20 = arith.extf %19 : vector<4x288xbf16> to vector<4x288xf32>
    %c0_14 = arith.constant 0 : index
    %c0_15 = arith.constant 0 : index
    %c37 = arith.constant 37 : index
    %21 = vector.load %arg1[%c0_14, %c0_15, %c37] : memref<1x4x326xbf16, #tpu.memory_space<vmem>>, vector<1x4x288xbf16>
    %22 = vector.shape_cast %21 : vector<1x4x288xbf16> to vector<4x288xbf16>
    %23 = arith.extf %22 : vector<4x288xbf16> to vector<4x288xf32>
    %c0_16 = arith.constant 0 : index
    %c0_17 = arith.constant 0 : index
    %c38 = arith.constant 38 : index
    %24 = vector.load %arg1[%c0_16, %c0_17, %c38] : memref<1x4x326xbf16, #tpu.memory_space<vmem>>, vector<1x4x288xbf16>
    %25 = vector.shape_cast %24 : vector<1x4x288xbf16> to vector<4x288xbf16>
    %26 = arith.extf %25 : vector<4x288xbf16> to vector<4x288xf32>
    %27 = tpu.concatenate %2, %5, %8, %11, %14, %17, %20, %23, %26 in 0 : vector<4x288xf32>, vector<4x288xf32>, vector<4x288xf32>, vector<4x288xf32>, vector<4x288xf32>, vector<4x288xf32>, vector<4x288xf32>, vector<4x288xf32>, vector<4x288xf32> -> vector<36x288xf32>
    %28 = arith.truncf %27 : vector<36x288xf32> to vector<36x288xbf16>
    %c0_18 = arith.constant 0 : index
    %c0_19 = arith.constant 0 : index
    %29 = vector.load %arg4[%c0_18, %c0_19] : memref<8x36xbf16, #tpu.memory_space<vmem>>, vector<8x36xbf16>
    %cst = arith.constant dense<0.000000e+00> : vector<8x288xf32>
    %30 = tpu.matmul %29, %28, %cst {dimension_numbers = #tpu.dot_dimension_numbers<[1], [0], [0], [1], [0, 0, 1, 1], [], []>} : vector<8x36xbf16>, vector<36x288xbf16>, vector<8x288xf32> -> vector<8x288xf32>
    %c0_20 = arith.constant 0 : index
    %c0_21 = arith.constant 0 : index
    %31 = vector.load %arg7[%c0_20, %c0_21] : memref<8x1xf32, #tpu.memory_space<vmem>>, vector<8x1xf32>
    %32 = vector.broadcast %31 : vector<8x1xf32> to vector<8x288xf32>
    %33 = arith.mulf %30, %32 : vector<8x288xf32>
    %c0_22 = arith.constant 0 : index
    %c0_23 = arith.constant 0 : index
    %34 = vector.load %arg10[%c0_22, %c0_23] : memref<8x1xf32, #tpu.memory_space<vmem>>, vector<8x1xf32>
    %35 = vector.broadcast %34 : vector<8x1xf32> to vector<8x288xf32>
    %36 = arith.addf %33, %35 : vector<8x288xf32>
    %37 = vector.extract_strided_slice %36 {offsets = [0, 0], sizes = [4, 288], strides = [1, 1]} : vector<8x288xf32> to vector<4x288xf32>
    %c0_24 = arith.constant 0 : index
    %c0_25 = arith.constant 0 : index
    %c0_26 = arith.constant 0 : index
    %38 = vector.load %arg13[%c0_24, %c0_25, %c0_26] : memref<1x4x288xf32, #tpu.memory_space<vmem>>, vector<1x4x288xf32>
    %39 = vector.shape_cast %38 : vector<1x4x288xf32> to vector<4x288xf32>
    %40 = vector.shape_cast %37 : vector<4x288xf32> to vector<1x4x288xf32>
    tpu.vector_store %arg13[%c0_24, %c0_25, %c0_26], %40 {strides = array<i32>} : memref<1x4x288xf32, #tpu.memory_space<vmem>>, vector<1x4x288xf32>,
    %c0_27 = arith.constant 0 : index
    %c0_28 = arith.constant 0 : index
    %c0_29 = arith.constant 0 : index
    %41 = vector.load %arg2[%c0_27, %c0_28, %c0_29] : memref<1x4x102xbf16, #tpu.memory_space<vmem>>, vector<1x4x80xbf16>
    %42 = vector.shape_cast %41 : vector<1x4x80xbf16> to vector<4x80xbf16>
    %43 = arith.extf %42 : vector<4x80xbf16> to vector<4x80xf32>
    %c0_30 = arith.constant 0 : index
    %c0_31 = arith.constant 0 : index
    %c1_32 = arith.constant 1 : index
    %44 = vector.load %arg2[%c0_30, %c0_31, %c1_32] : memref<1x4x102xbf16, #tpu.memory_space<vmem>>, vector<1x4x80xbf16>
    %45 = vector.shape_cast %44 : vector<1x4x80xbf16> to vector<4x80xbf16>
    %46 = arith.extf %45 : vector<4x80xbf16> to vector<4x80xf32>
    %c0_33 = arith.constant 0 : index
    %c0_34 = arith.constant 0 : index
    %c2_35 = arith.constant 2 : index
    %47 = vector.load %arg2[%c0_33, %c0_34, %c2_35] : memref<1x4x102xbf16, #tpu.memory_space<vmem>>, vector<1x4x80xbf16>
    %48 = vector.shape_cast %47 : vector<1x4x80xbf16> to vector<4x80xbf16>
    %49 = arith.extf %48 : vector<4x80xbf16> to vector<4x80xf32>
    %c0_36 = arith.constant 0 : index
    %c0_37 = arith.constant 0 : index
    %c10 = arith.constant 10 : index
    %50 = vector.load %arg2[%c0_36, %c0_37, %c10] : memref<1x4x102xbf16, #tpu.memory_space<vmem>>, vector<1x4x80xbf16>
    %51 = vector.shape_cast %50 : vector<1x4x80xbf16> to vector<4x80xbf16>
    %52 = arith.extf %51 : vector<4x80xbf16> to vector<4x80xf32>
    %c0_38 = arith.constant 0 : index
    %c0_39 = arith.constant 0 : index
    %c11 = arith.constant 11 : index
    %53 = vector.load %arg2[%c0_38, %c0_39, %c11] : memref<1x4x102xbf16, #tpu.memory_space<vmem>>, vector<1x4x80xbf16>
    %54 = vector.shape_cast %53 : vector<1x4x80xbf16> to vector<4x80xbf16>
    %55 = arith.extf %54 : vector<4x80xbf16> to vector<4x80xf32>
    %c0_40 = arith.constant 0 : index
    %c0_41 = arith.constant 0 : index
    %c12 = arith.constant 12 : index
    %56 = vector.load %arg2[%c0_40, %c0_41, %c12] : memref<1x4x102xbf16, #tpu.memory_space<vmem>>, vector<1x4x80xbf16>
    %57 = vector.shape_cast %56 : vector<1x4x80xbf16> to vector<4x80xbf16>
    %58 = arith.extf %57 : vector<4x80xbf16> to vector<4x80xf32>
    %c0_42 = arith.constant 0 : index
    %c0_43 = arith.constant 0 : index
    %c20_44 = arith.constant 20 : index
    %59 = vector.load %arg2[%c0_42, %c0_43, %c20_44] : memref<1x4x102xbf16, #tpu.memory_space<vmem>>, vector<1x4x80xbf16>
    %60 = vector.shape_cast %59 : vector<1x4x80xbf16> to vector<4x80xbf16>
    %61 = arith.extf %60 : vector<4x80xbf16> to vector<4x80xf32>
    %c0_45 = arith.constant 0 : index
    %c0_46 = arith.constant 0 : index
    %c21 = arith.constant 21 : index
    %62 = vector.load %arg2[%c0_45, %c0_46, %c21] : memref<1x4x102xbf16, #tpu.memory_space<vmem>>, vector<1x4x80xbf16>
    %63 = vector.shape_cast %62 : vector<1x4x80xbf16> to vector<4x80xbf16>
    %64 = arith.extf %63 : vector<4x80xbf16> to vector<4x80xf32>
    %c0_47 = arith.constant 0 : index
    %c0_48 = arith.constant 0 : index
    %c22 = arith.constant 22 : index
    %65 = vector.load %arg2[%c0_47, %c0_48, %c22] : memref<1x4x102xbf16, #tpu.memory_space<vmem>>, vector<1x4x80xbf16>
    %66 = vector.shape_cast %65 : vector<1x4x80xbf16> to vector<4x80xbf16>
    %67 = arith.extf %66 : vector<4x80xbf16> to vector<4x80xf32>
    %68 = tpu.concatenate %43, %46, %49, %52, %55, %58, %61, %64, %67 in 0 : vector<4x80xf32>, vector<4x80xf32>, vector<4x80xf32>, vector<4x80xf32>, vector<4x80xf32>, vector<4x80xf32>, vector<4x80xf32>, vector<4x80xf32>, vector<4x80xf32> -> vector<36x80xf32>
    %69 = arith.truncf %68 : vector<36x80xf32> to vector<36x80xbf16>
    %c0_49 = arith.constant 0 : index
    %c0_50 = arith.constant 0 : index
    %70 = vector.load %arg5[%c0_49, %c0_50] : memref<8x36xbf16, #tpu.memory_space<vmem>>, vector<8x36xbf16>
    %cst_51 = arith.constant dense<0.000000e+00> : vector<8x80xf32>
    %71 = tpu.matmul %70, %69, %cst_51 {dimension_numbers = #tpu.dot_dimension_numbers<[1], [0], [0], [1], [0, 0, 1, 1], [], []>} : vector<8x36xbf16>, vector<36x80xbf16>, vector<8x80xf32> -> vector<8x80xf32>
    %c0_52 = arith.constant 0 : index
    %c0_53 = arith.constant 0 : index
    %72 = vector.load %arg8[%c0_52, %c0_53] : memref<8x1xf32, #tpu.memory_space<vmem>>, vector<8x1xf32>
    %73 = vector.broadcast %72 : vector<8x1xf32> to vector<8x80xf32>
    %74 = arith.mulf %71, %73 : vector<8x80xf32>
    %c0_54 = arith.constant 0 : index
    %c0_55 = arith.constant 0 : index
    %75 = vector.load %arg11[%c0_54, %c0_55] : memref<8x1xf32, #tpu.memory_space<vmem>>, vector<8x1xf32>
    %76 = vector.broadcast %75 : vector<8x1xf32> to vector<8x80xf32>
    %77 = arith.addf %74, %76 : vector<8x80xf32>
    %78 = vector.extract_strided_slice %77 {offsets = [0, 0], sizes = [2, 80], strides = [1, 1]} : vector<8x80xf32> to vector<2x80xf32>
    %c0_56 = arith.constant 0 : index
    %c0_57 = arith.constant 0 : index
    %c0_58 = arith.constant 0 : index
    %79 = vector.load %arg14[%c0_56, %c0_57, %c0_58] : memref<1x2x80xf32, #tpu.memory_space<vmem>>, vector<1x2x80xf32>
    %80 = vector.shape_cast %79 : vector<1x2x80xf32> to vector<2x80xf32>
    %81 = vector.shape_cast %78 : vector<2x80xf32> to vector<1x2x80xf32>
    tpu.vector_store %arg14[%c0_56, %c0_57, %c0_58], %81 {strides = array<i32>} : memref<1x2x80xf32, #tpu.memory_space<vmem>>, vector<1x2x80xf32>,
    %c0_59 = arith.constant 0 : index
    %c0_60 = arith.constant 0 : index
    %c0_61 = arith.constant 0 : index
    %82 = vector.load %arg3[%c0_59, %c0_60, %c0_61] : memref<1x4x38xbf16, #tpu.memory_space<vmem>>, vector<1x4x24xbf16>
    %83 = vector.shape_cast %82 : vector<1x4x24xbf16> to vector<4x24xbf16>
    %84 = arith.extf %83 : vector<4x24xbf16> to vector<4x24xf32>
    %c0_62 = arith.constant 0 : index
    %c0_63 = arith.constant 0 : index
    %c1_64 = arith.constant 1 : index
    %85 = vector.load %arg3[%c0_62, %c0_63, %c1_64] : memref<1x4x38xbf16, #tpu.memory_space<vmem>>, vector<1x4x24xbf16>
    %86 = vector.shape_cast %85 : vector<1x4x24xbf16> to vector<4x24xbf16>
    %87 = arith.extf %86 : vector<4x24xbf16> to vector<4x24xf32>
    %c0_65 = arith.constant 0 : index
    %c0_66 = arith.constant 0 : index
    %c2_67 = arith.constant 2 : index
    %88 = vector.load %arg3[%c0_65, %c0_66, %c2_67] : memref<1x4x38xbf16, #tpu.memory_space<vmem>>, vector<1x4x24xbf16>
    %89 = vector.shape_cast %88 : vector<1x4x24xbf16> to vector<4x24xbf16>
    %90 = arith.extf %89 : vector<4x24xbf16> to vector<4x24xf32>
    %c0_68 = arith.constant 0 : index
    %c0_69 = arith.constant 0 : index
    %c6 = arith.constant 6 : index
    %91 = vector.load %arg3[%c0_68, %c0_69, %c6] : memref<1x4x38xbf16, #tpu.memory_space<vmem>>, vector<1x4x24xbf16>
    %92 = vector.shape_cast %91 : vector<1x4x24xbf16> to vector<4x24xbf16>
    %93 = arith.extf %92 : vector<4x24xbf16> to vector<4x24xf32>
    %c0_70 = arith.constant 0 : index
    %c0_71 = arith.constant 0 : index
    %c7 = arith.constant 7 : index
    %94 = vector.load %arg3[%c0_70, %c0_71, %c7] : memref<1x4x38xbf16, #tpu.memory_space<vmem>>, vector<1x4x24xbf16>
    %95 = vector.shape_cast %94 : vector<1x4x24xbf16> to vector<4x24xbf16>
    %96 = arith.extf %95 : vector<4x24xbf16> to vector<4x24xf32>
    %c0_72 = arith.constant 0 : index
    %c0_73 = arith.constant 0 : index
    %c8 = arith.constant 8 : index
    %97 = vector.load %arg3[%c0_72, %c0_73, %c8] : memref<1x4x38xbf16, #tpu.memory_space<vmem>>, vector<1x4x24xbf16>
    %98 = vector.shape_cast %97 : vector<1x4x24xbf16> to vector<4x24xbf16>
    %99 = arith.extf %98 : vector<4x24xbf16> to vector<4x24xf32>
    %c0_74 = arith.constant 0 : index
    %c0_75 = arith.constant 0 : index
    %c12_76 = arith.constant 12 : index
    %100 = vector.load %arg3[%c0_74, %c0_75, %c12_76] : memref<1x4x38xbf16, #tpu.memory_space<vmem>>, vector<1x4x24xbf16>
    %101 = vector.shape_cast %100 : vector<1x4x24xbf16> to vector<4x24xbf16>
    %102 = arith.extf %101 : vector<4x24xbf16> to vector<4x24xf32>
    %c0_77 = arith.constant 0 : index
    %c0_78 = arith.constant 0 : index
    %c13 = arith.constant 13 : index
    %103 = vector.load %arg3[%c0_77, %c0_78, %c13] : memref<1x4x38xbf16, #tpu.memory_space<vmem>>, vector<1x4x24xbf16>
    %104 = vector.shape_cast %103 : vector<1x4x24xbf16> to vector<4x24xbf16>
    %105 = arith.extf %104 : vector<4x24xbf16> to vector<4x24xf32>
    %c0_79 = arith.constant 0 : index
    %c0_80 = arith.constant 0 : index
    %c14 = arith.constant 14 : index
    %106 = vector.load %arg3[%c0_79, %c0_80, %c14] : memref<1x4x38xbf16, #tpu.memory_space<vmem>>, vector<1x4x24xbf16>
    %107 = vector.shape_cast %106 : vector<1x4x24xbf16> to vector<4x24xbf16>
    %108 = arith.extf %107 : vector<4x24xbf16> to vector<4x24xf32>
    %109 = tpu.concatenate %84, %87, %90, %93, %96, %99, %102, %105, %108 in 0 : vector<4x24xf32>, vector<4x24xf32>, vector<4x24xf32>, vector<4x24xf32>, vector<4x24xf32>, vector<4x24xf32>, vector<4x24xf32>, vector<4x24xf32>, vector<4x24xf32> -> vector<36x24xf32>
    %110 = arith.truncf %109 : vector<36x24xf32> to vector<36x24xbf16>
    %c0_81 = arith.constant 0 : index
    %c0_82 = arith.constant 0 : index
    %111 = vector.load %arg6[%c0_81, %c0_82] : memref<8x36xbf16, #tpu.memory_space<vmem>>, vector<8x36xbf16>
    %cst_83 = arith.constant dense<0.000000e+00> : vector<8x24xf32>
    %112 = tpu.matmul %111, %110, %cst_83 {dimension_numbers = #tpu.dot_dimension_numbers<[1], [0], [0], [1], [0, 0, 1, 1], [], []>} : vector<8x36xbf16>, vector<36x24xbf16>, vector<8x24xf32> -> vector<8x24xf32>
    %c0_84 = arith.constant 0 : index
    %c0_85 = arith.constant 0 : index
    %113 = vector.load %arg9[%c0_84, %c0_85] : memref<8x1xf32, #tpu.memory_space<vmem>>, vector<8x1xf32>
    %114 = vector.broadcast %113 : vector<8x1xf32> to vector<8x24xf32>
    %115 = arith.mulf %112, %114 : vector<8x24xf32>
    %c0_86 = arith.constant 0 : index
    %c0_87 = arith.constant 0 : index
    %116 = vector.load %arg12[%c0_86, %c0_87] : memref<8x1xf32, #tpu.memory_space<vmem>>, vector<8x1xf32>
    %117 = vector.broadcast %116 : vector<8x1xf32> to vector<8x24xf32>
    %118 = arith.addf %115, %117 : vector<8x24xf32>
    %119 = vector.extract_strided_slice %118 {offsets = [0, 0], sizes = [2, 24], strides = [1, 1]} : vector<8x24xf32> to vector<2x24xf32>
    %c0_88 = arith.constant 0 : index
    %c0_89 = arith.constant 0 : index
    %c0_90 = arith.constant 0 : index
    %120 = vector.load %arg15[%c0_88, %c0_89, %c0_90] : memref<1x2x24xf32, #tpu.memory_space<vmem>>, vector<1x2x24xf32>
    %121 = vector.shape_cast %120 : vector<1x2x24xf32> to vector<2x24xf32>
    %122 = vector.shape_cast %119 : vector<2x24xf32> to vector<1x2x24xf32>
    tpu.vector_store %arg15[%c0_88, %c0_89, %c0_90], %122 {strides = array<i32>} : memref<1x2x24xf32, #tpu.memory_space<vmem>>, vector<1x2x24xf32>,
    return
  }
  func.func @transform_0(%arg0: i32) -> (i32, i32, i32) {
    %c0_i32 = arith.constant 0 : i32
    %c0_i32_0 = arith.constant 0 : i32
    %c0_i32_1 = arith.constant 0 : i32
    return %arg0, %c0_i32, %c0_i32_0 : i32, i32, i32
  }
  func.func @transform_1(%arg0: i32) -> (i32, i32, i32) {
    %c0_i32 = arith.constant 0 : i32
    %c0_i32_0 = arith.constant 0 : i32
    %c0_i32_1 = arith.constant 0 : i32
    return %arg0, %c0_i32, %c0_i32_0 : i32, i32, i32
  }
  func.func @transform_2(%arg0: i32) -> (i32, i32, i32) {
    %c0_i32 = arith.constant 0 : i32
    %c0_i32_0 = arith.constant 0 : i32
    %c0_i32_1 = arith.constant 0 : i32
    return %arg0, %c0_i32, %c0_i32_0 : i32, i32, i32
  }
  func.func @transform_3(%arg0: i32) -> (i32, i32) {
    %c0_i32 = arith.constant 0 : i32
    %c0_i32_0 = arith.constant 0 : i32
    %c0_i32_1 = arith.constant 0 : i32
    return %c0_i32, %c0_i32_0 : i32, i32
  }
  func.func @transform_4(%arg0: i32) -> (i32, i32) {
    %c0_i32 = arith.constant 0 : i32
    %c0_i32_0 = arith.constant 0 : i32
    %c0_i32_1 = arith.constant 0 : i32
    return %c0_i32, %c0_i32_0 : i32, i32
  }
  func.func @transform_5(%arg0: i32) -> (i32, i32) {
    %c0_i32 = arith.constant 0 : i32
    %c0_i32_0 = arith.constant 0 : i32
    %c0_i32_1 = arith.constant 0 : i32
    return %c0_i32, %c0_i32_0 : i32, i32
  }
  func.func @transform_6(%arg0: i32) -> (i32, i32) {
    %c0_i32 = arith.constant 0 : i32
    %c0_i32_0 = arith.constant 0 : i32
    %c0_i32_1 = arith.constant 0 : i32
    return %c0_i32, %c0_i32_0 : i32, i32
  }
  func.func @transform_7(%arg0: i32) -> (i32, i32) {
    %c0_i32 = arith.constant 0 : i32
    %c0_i32_0 = arith.constant 0 : i32
    %c0_i32_1 = arith.constant 0 : i32
    return %c0_i32, %c0_i32_0 : i32, i32
  }
  func.func @transform_8(%arg0: i32) -> (i32, i32) {
    %c0_i32 = arith.constant 0 : i32
    %c0_i32_0 = arith.constant 0 : i32
    %c0_i32_1 = arith.constant 0 : i32
    return %c0_i32, %c0_i32_0 : i32, i32
  }
  func.func @transform_9(%arg0: i32) -> (i32, i32) {
    %c0_i32 = arith.constant 0 : i32
    %c0_i32_0 = arith.constant 0 : i32
    %c0_i32_1 = arith.constant 0 : i32
    return %c0_i32, %c0_i32_0 : i32, i32
  }
  func.func @transform_10(%arg0: i32) -> (i32, i32) {
    %c0_i32 = arith.constant 0 : i32
    %c0_i32_0 = arith.constant 0 : i32
    %c0_i32_1 = arith.constant 0 : i32
    return %c0_i32, %c0_i32_0 : i32, i32
  }
  func.func @transform_11(%arg0: i32) -> (i32, i32) {
    %c0_i32 = arith.constant 0 : i32
    %c0_i32_0 = arith.constant 0 : i32
    %c0_i32_1 = arith.constant 0 : i32
    return %c0_i32, %c0_i32_0 : i32, i32
  }
  func.func @transform_12(%arg0: i32) -> (i32, i32, i32) {
    %c0_i32 = arith.constant 0 : i32
    %c0_i32_0 = arith.constant 0 : i32
    %c0_i32_1 = arith.constant 0 : i32
    return %arg0, %c0_i32, %c0_i32_0 : i32, i32, i32
  }
  func.func @transform_13(%arg0: i32) -> (i32, i32, i32) {
    %c0_i32 = arith.constant 0 : i32
    %c0_i32_0 = arith.constant 0 : i32
    %c0_i32_1 = arith.constant 0 : i32
    return %arg0, %c0_i32, %c0_i32_0 : i32, i32, i32
  }
  func.func @transform_14(%arg0: i32) -> (i32, i32, i32) {
    %c0_i32 = arith.constant 0 : i32
    %c0_i32_0 = arith.constant 0 : i32
    %c0_i32_1 = arith.constant 0 : i32
    return %arg0, %c0_i32, %c0_i32_0 : i32, i32, i32
  }
}

</mosaic_0001>

<bundles_post_ra>
// kernel: conv_bn_act2_forward.3
= control target key start
LH: loop header
LB: loop body
LE: loop exit
PB: predicated region body
PF: predicated region fallthrough
CT: control target
= control target key end

     0   :  { %s1361_s29 = smov 0   ;;  %s1539_s0 = inlined_call_operand.vmem [shape: bf16[2,4,326], index: 0, kind: input, shape index: {}]   ;;  %s1540_s1 = inlined_call_operand.vmem [shape: bf16[2,4,102], index: 1, kind: input, shape index: {}]   ;;  %s1541_s2 = inlined_call_operand.vmem [shape: bf16[2,4,38], index: 2, kind: input, shape index: {}]   ;;  %s1542_s3 = inlined_call_operand.vmem [shape: bf16[8,36], index: 3, kind: input, shape index: {}]   ;;  %s1543_s4 = inlined_call_operand.vmem [shape: bf16[8,36], index: 4, kind: input, shape index: {}]   ;;  %s1544_s5 = inlined_call_operand.vmem [shape: bf16[8,36], index: 5, kind: input, shape index: {}]   ;;  %s1545_s6 = inlined_call_operand.vmem [shape: f32[8,1], index: 6, kind: input, shape index: {}]   ;;  %s1546_s7 = inlined_call_operand.vmem [shape: f32[8,1], index: 7, kind: input, shape index: {}]   ;;  %s1547_s8 = inlined_call_operand.vmem [shape: f32[8,1], index: 8, kind: input, shape index: {}]   ;;  %s1548_s9 = inlined_call_operand.vmem [shape: f32[8,1], index: 9, kind: input, shape index: {}]   ;;  %s1549_s10 = inlined_call_operand.vmem [shape: f32[8,1], index: 10, kind: input, shape index: {}]   ;;  %s1550_s11 = inlined_call_operand.vmem [shape: f32[8,1], index: 11, kind: input, shape index: {}]   ;;  %s1551_s12 = inlined_call_operand.vmem [shape: f32[2,4,288], index: 12, kind: output, shape index: {0}]   ;;  %s1552_s13 = inlined_call_operand.vmem [shape: f32[2,2,80], index: 13, kind: output, shape index: {1}]   ;;  %s1553_s14 = inlined_call_operand.vmem [shape: f32[2,2,24], index: 14, kind: output, shape index: {2}]  }
   0x1 LB: > { %s1109_s30 = sadd.s32 4294967295, %s1263_s29   ;;  %p1113_p0 = scmp.ge.s32.totalorder %s1263_s29, 1  ;;  %s1263_s29 = sphi %s1361_s29, %s25_s29  }
   0x2   : > { %p435_p1 = scmp.lt.s32.totalorder %s1263_s29, 3 }
   0x4   : > { %p436_p2 = pnand %p1113_p0, %p435_p1 }
   0x5   : > { %p497_p3 = scmp.lt.s32.totalorder (!%p436_p2), %s1109_s30, 1  ;;  %s1265_s23 = smov (!%p436_p2), 126   ;;  %v1266_v11 = vmov (!%p436_p2), 0.0   ;;  %v1273_v15 = vmov (!%p436_p2), 0   ;;  %vm1274_vm0 = vmmov (!%p436_p2), 0   ;;  %v747_v20 = vld [vmem:[%s1545_s6] sm:$0xff] (!%p436_p2) }
   0x6   : > { %439 = sbr.rel (%p436_p2) target bundleno = 416 (0x1a0), region = 68  ;;  %1139 = vmatprep.subr.bf16.mxu1 (!%p436_p2), %v1266_v11  ;;  %s1267_s24 = smov (!%p436_p2), 110   ;;  %698 = vmatprep.mubr.bf16.mxu0 (!%p436_p2), %v1273_v15  ;;  %v756_v21 = vld [vmem:[%s1548_s9] sm:$0xff] (!%p436_p2)  ;;  %vm539_vm1 = vcmask (!%p436_p2), 1039360   ;;  %vm563_vm2 = vcmask (!%p436_p2), 900096   ;;  %vm629_vm3 = vcmask (!%p436_p2), 1043456  }
   0x7   : > { %s1268_s25 = smov (!%p436_p2), 127   ;;  %s1269_s26 = smov (!%p436_p2), 109   ;;  %1255 = vset.pattern.permute.xlu1 (!%p436_p2), %v1273_v15  ;;  %1256 = vset.pattern.permute.xlu0 (!%p436_p2), %v1273_v15  ;;  %v854_v22 = vld [vmem:[%s1546_s7] sm:$0xff] (!%p436_p2)  ;;  %vm551_vm4 = vcmask (!%p436_p2), 1031168   ;;  %vm587_vm5 = vcmask (!%p436_p2), 883712   ;;  %vm575_vm6 = vcmask (!%p436_p2), 891904  }
   0x8   : > { %s1270_s27 = smov (!%p436_p2), 108   ;;  %s1271_s28 = smov (!%p436_p2), 92   ;;  %1145 = vmatprep.mubr.msk.bf16.mxu1 (!%p436_p2), %vm1274_vm0, %v1266_v11  ;;  %v861_v23 = vld [vmem:[%s1549_s10] sm:$0xff] (!%p436_p2)  ;;  %vm611_vm7 = vcmask (!%p436_p2), 744448   ;;  %vm599_vm8 = vcmask (!%p436_p2), 752640   ;;  %vm623_vm9 = vcmask (!%p436_p2), 736256  }
   0x9   : > { %s1275_s20 = smov (!%p436_p2), 90   ;;  %s1276_s21 = smov (!%p436_p2), 118   ;;  %v952_v24 = vld [vmem:[%s1547_s8] sm:$0xff] (!%p436_p2)  ;;  %vm656_vm10 = vcmask (!%p436_p2), 1041408   ;;  %vm652_vm11 = vcmask (!%p436_p2), 293888   ;;  %vm770_vm12 = vcmask (!%p436_p2), 257024  }
   0xa   : > { %s1284_s17 = smov (!%p436_p2), 106   ;;  %v959_v25 = vld [vmem:[%s1550_s11] sm:$0xff] (!%p436_p2)  ;;  %vm868_vm13 = vcmask (!%p436_p2), 648192   ;;  %vm966_vm14 = vcmask (!%p436_p2), 189440  }
   0xd   : > { %s1555_s30 = smov (!%p497_p3, %s1109_s30), 1 }
   0xe   : > { %s1169_s15 = smul.u32 6, %s1555_s30  ;;  %s1373_s16 = sshll.u32 %s1555_s30, 1 }
   0xf   : > { %s505_s19 = scalar_lea.vmem %s1540_s1, %s1373_s16 }
  0x10   : > { %s501_s22 = scalar_lea.vmem %s1539_s0, %s1169_s15  ;;  %v772_v0 = vld [vmem:[%s505_s19] sm:$0x3]  ;;  %s1272_s15 = smov 91  }
  0x11   : > { %v524_v1 = vld [vmem:[%s501_s22] sm:$0x3f]  ;;  %v1382_v2 = vunpack.c.l.bf16 %v772_v0  ;;  %s509_s19 = scalar_lea.vmem %s1541_s2, %s1373_s16  ;;  %s1277_s22 = smov 122  }
  0x12   : > { %v1384_v3 = vunpack.c.l.bf16 %v524_v1  ;;  %v1386_v4 = vunpack.c.h.bf16 %v524_v1  ;;  %v870_v14 = vld [vmem:[%s509_s19] sm:$0x3]  ;;  %s522_s19 = scalar_lea.vmem %s1553_s14, %s1373_s16 }
  0x13   : > { %v775_v8 = vcombine.low %v1382_v2, %v1382_v2  ;;  %v1418_v17 = vunpack.c.l.bf16 %v870_v14 }
  0x14   : > { %v1200_v5 = vpack.i.bf16 %v1382_v2, %v1384_v3  ;;  %v532_v6 = vcombine.low %v1386_v4, %v1386_v4  ;;  %v531_v7 = vcombine.low %v1384_v3, %v1384_v3  ;;  %v1400_v10 = vcombine.high %v1384_v3, %v1384_v3 }
  0x15   : > { %v873_v18 = vcombine.low %v1418_v17, %v1418_v17  ;;  %v1250_v19 = vpack.i.bf16 %v1418_v17, %v775_v8 }
  0x16   : > { %1201 = vrot.lane.b32.xlu0 %v1200_v5, %s1265_s23  ;;  %v1215_v9 = vpack.i.bf16 %v532_v6, %v1384_v3  ;;  %v1220_v12 = vpack.i.bf16 %v775_v8, %v531_v7  ;;  %v1210_v13 = vpack.i.bf16 %v1386_v4, %v1400_v10  ;;  %v1245_v16 = vpack.i.bf16 %v1400_v10, %v1384_v3 }
  0x18   : > { %1216 = vrot.lane.b32.xlu1 %v1215_v9, %s1267_s24 }
  0x1a   : > { %1206 = vrot.lane.b32.xlu0 %v1215_v9, %s1268_s25 }
  0x1c   : > { %1221 = vrot.lane.b32.xlu1 %v1220_v12, %s1268_s25 }
  0x1e   : > { %1211 = vrot.lane.b32.xlu0 %v1210_v13, %s1265_s23 }
  0x20   : > { %557 = vrot.lane.b32.xlu1 %v531_v7, %s1267_s24  ;;  %s1278_s24 = smov 117  }
  0x22   : > { %1226 = vrot.lane.b32.xlu0 %v1210_v13, %s1269_s26 }
  0x24   : > { %1231 = vrot.lane.b32.xlu1 %v1215_v9, %s1270_s27 }
  0x26   : > { %1236 = vrot.lane.b32.xlu0 %v1210_v13, %s1271_s28 }
  0x28   : > { %1241 = vrot.lane.b32.xlu1 %v1215_v9, %s1272_s15 }
  0x2a   : > { %569 = vrot.lane.b32.xlu0 %v1384_v3, %s1269_s26  ;;  %s1279_s26 = smov 116  }
  0x2c   : > { %581 = vrot.lane.b32.xlu1 %v531_v7, %s1270_s27 }
  0x2e   : > { %593 = vrot.lane.b32.xlu0 %v1384_v3, %s1271_s28  ;;  %s1280_s28 = smov 107  }
  0x30   : > { %605 = vrot.lane.b32.xlu1 %v531_v7, %s1272_s15  ;;  %s1281_s15 = smov 121  }
  0x32   : > { %1246 = vrot.lane.b32.xlu0 %v1245_v16, %s1275_s20 }
  0x34   : > { %621 = vrot.lane.b32.xlu1 %v1386_v4, %s1275_s20  ;;  %s1285_s20 = smov 114  }
  0x36   : > { %782 = vrot.lane.b32.xlu0 %v775_v8, %s1276_s21 }
  0x38   : > { %874 = vrot.lane.b32.xlu1 %v873_v18, %s1268_s25  ;;  %s1282_s25 = smov 120  }
  0x3a   : > { %877 = vrot.lane.b32.xlu0 %v1418_v17, %s1265_s23  ;;  %s1283_s23 = smov 115  }
  0x3c   : > { %880 = vrot.lane.b32.xlu1 %v873_v18, %s1277_s22 }
  0x3e   : > { %785 = vrot.lane.b32.xlu0 %v1382_v2, %s1278_s24  ;;  %s1170_s24 = smul.u32 12, %s1555_s30 }
  0x40   : > { %1251 = vrot.lane.b32.xlu1 %v1250_v19, %s1279_s26 }
  0x42   : > { %791 = vrot.lane.b32.xlu0 %v1382_v2, %s1270_s27 }
  0x44   : > { %794 = vrot.lane.b32.xlu1 %v775_v8, %s1280_s28 }
  0x46   : > { %883 = vrot.lane.b32.xlu0 %v1418_v17, %s1281_s15  ;;  %s514_s15 = scalar_lea.vmem %s1551_s12, %s1170_s24 }
  0x48   : > { %886 = vrot.lane.b32.xlu1 %v873_v18, %s1282_s25 }
  0x4a   : > { %892 = vrot.lane.b32.xlu0 %v873_v18, %s1283_s23  ;;  %s518_s23 = scalar_lea.vmem %s1552_s13, %s1373_s16 }
  0x4c   : > { %797 = vrot.lane.b32.xlu1 %v1382_v2, %s1284_s17 }
  0x4e   : > { %895 = vrot.lane.b32.xlu0 %v1418_v17, %s1285_s20 }
  0x50   : > { %750 = vperm.xlu1 %1255, %v747_v20  }
  0x52   : > { %759 = vperm.xlu0 %1256, %v756_v21  }
  0x54   : > { %857 = vperm.xlu1 %1255, %v854_v22  }
  0x56   : > { %864 = vperm.xlu0 %1256, %v861_v23  }
  0x58   : > { %955 = vperm.xlu1 %1255, %v952_v24  }
  0x5c   : > { %962 = vperm.xlu1 %1255, %v959_v25  }
  0x88   : > { %v1453_v26 = vpop.permute.xlu0 %1201 }
  0x89   : > { %v1203_v37 = vunpack.i.l.bf16 %v1453_v26 }
  0x8a   : > { %v1217_v27 = vpop.permute.xlu1 %1216 }
  0x8b   : > { %v1219_v31 = vunpack.i.h.bf16 %v1217_v27  ;;  %v1218_v32 = vunpack.i.l.bf16 %v1217_v27 }
  0x8c   : > { %v1207_v28 = vpop.permute.xlu0 %1206 }
  0x8d   : > { %v1209_v29 = vunpack.i.h.bf16 %v1207_v28  ;;  %v1208_v30 = vunpack.i.l.bf16 %v1207_v28  ;;  %v565_v43 = vsel %vm563_vm2, %v1218_v32, %v1219_v31 }
  0x8e   : > { %v1455_v33 = vpop.permute.xlu1 %1221 }
  0x8f   : > { %v1223_v34 = vunpack.i.l.bf16 %v1455_v33  ;;  %v541_v35 = vsel %vm539_vm1, %v1208_v30, %v1209_v29  ;;  %v632_v42 = vsel %vm629_vm3, %v1386_v4, %v1209_v29 }
  0x90   : > { %v1212_v36 = vpop.permute.xlu0 %1211  ;;  %v631_v44 = vsel %vm629_vm3, %v1400_v10, %v541_v35 }
  0x91   : > { %v1214_v38 = vunpack.i.h.bf16 %v1212_v36  ;;  %v1213_v39 = vunpack.i.l.bf16 %v1212_v36  ;;  %v540_v40 = vsel %vm539_vm1, %v1223_v34, %v1208_v30  ;;  %v1204_v36 = vunpack.i.h.bf16 %v1453_v26  ;;  %v651_v26 = vld [vmem:[%s1542_s3] sm:$0xf] }
  0x92   : > { %v558_v41 = vpop.permute.xlu1 %557  ;;  %v630_v52 = vsel %vm629_vm3, %v1384_v3, %v540_v40 }
  0x93   : > { %v564_v45 = vsel %vm563_vm2, %v558_v41, %v1218_v32  ;;  %v635_v46 = vsel %vm629_vm3, %v1214_v38, %v1219_v31  ;;  %v553_v47 = vsel %vm551_vm4, %v1213_v39, %v1214_v38  ;;  %v552_v48 = vsel %vm551_vm4, %v1203_v37, %v1213_v39 }
  0x94   : > { %v1227_v49 = vpop.permute.xlu0 %1226  ;;  %v644_v50 = vpack.c.bf16 %v635_v46, %v632_v42  ;;  %v634_v51 = vsel %vm629_vm3, %v553_v47, %v565_v43  ;;  %v633_v53 = vsel %vm629_vm3, %v552_v48, %v564_v45  ;;  %v1224_v37 = vunpack.i.h.bf16 %v1455_v33 }
  0x95   : > { %v643_v54 = vpack.c.bf16 %v634_v51, %v631_v44  ;;  %v642_v55 = vpack.c.bf16 %v633_v53, %v630_v52  ;;  %v1229_v59 = vunpack.i.h.bf16 %v1227_v49  ;;  %v1228_v60 = vunpack.i.l.bf16 %v1227_v49 }
  0x96   : > { %v1232_v56 = vpop.permute.xlu1 %1231  ;;  %1140 = vmatpush3.bf16.msra.mxu1 %v644_v50  ;;  %v800_v33 = vsel %vm629_vm3, %v1382_v2, %v1224_v37 }
  0x97   : > { %v1234_v57 = vunpack.i.h.bf16 %v1232_v56  ;;  %v1233_v58 = vunpack.i.l.bf16 %v1232_v56  ;;  %666 = vmatprep.subr.bf16.mxu0 %v643_v54  ;;  %1141 = vmatprep.subr.bf16.mxu1 %v1266_v11  ;;  %v577_v6 = vsel %vm575_vm6, %v1228_v60, %v1229_v59 }
  0x98   : > { %v1237_v61 = vpop.permute.xlu0 %1236  ;;  %667 = vmatpush1.bf16.msra.mxu0 %v642_v55 }
  0x99   : > { %v1239_v62 = vunpack.i.h.bf16 %v1237_v61  ;;  %v1238_v63 = vunpack.i.l.bf16 %v1237_v61  ;;  %v589_v4 = vsel %vm587_vm5, %v1233_v58, %v1234_v57  ;;  %v638_v9 = vsel %vm629_vm3, %v1229_v59, %v1234_v57 }
  0x9a   : > { %v1242_v0 = vpop.permute.xlu1 %1241  ;;  %v637_v14 = vsel %vm629_vm3, %v577_v6, %v589_v4  ;;  %v807_v6 = vld [vmem:[%s1543_s4] sm:$0xf] }
  0x9b   : > { %v1244_v1 = vunpack.i.h.bf16 %v1242_v0  ;;  %v1243_v3 = vunpack.i.l.bf16 %v1242_v0  ;;  %v601_v8 = vsel %vm599_vm8, %v1238_v63, %v1239_v62 }
  0x9c   : > { %v570_v5 = vpop.permute.xlu0 %569 }
  0x9d   : > { %v613_v7 = vsel %vm611_vm7, %v1243_v3, %v1244_v1  ;;  %v641_v10 = vsel %vm629_vm3, %v1239_v62, %v1244_v1  ;;  %v576_v21 = vsel %vm575_vm6, %v570_v5, %v1228_v60 }
  0x9e   : > { %v582_v12 = vpop.permute.xlu1 %581  ;;  %v647_v13 = vpack.c.bf16 %v641_v10, %v638_v9  ;;  %v640_v15 = vsel %vm629_vm3, %v601_v8, %v613_v7  ;;  %v905_v8 = vld [vmem:[%s1544_s5] sm:$0xf] }
  0x9f   : > { %v646_v16 = vpack.c.bf16 %v640_v15, %v637_v14  ;;  %v588_v19 = vsel %vm587_vm5, %v582_v12, %v1233_v58 }
  0xa0   : > { %v594_v18 = vpop.permute.xlu0 %593  ;;  %1142 = vmatpush3.bf16.msra.mxu1 %v647_v13  ;;  %v636_v24 = vsel %vm629_vm3, %v576_v21, %v588_v19 }
  0xa1   : > { %668 = vmatprep.subr.bf16.mxu0 %v646_v16  ;;  %1143 = vmatprep.subr.bf16.mxu1 %v1266_v11  ;;  %v600_v22 = vsel %vm599_vm8, %v594_v18, %v1238_v63 }
  0xa2   : > { %v606_v20 = vpop.permute.xlu1 %605 }
  0xa3   : > { %v612_v23 = vsel %vm611_vm7, %v606_v20, %v1243_v3 }
  0xa4   : > { %v639_v25 = vsel %vm629_vm3, %v600_v22, %v612_v23  ;;  %v1247_v27 = vpop.permute.xlu0 %1246 }
  0xa5   : > { %v1249_v28 = vunpack.i.h.bf16 %v1247_v27  ;;  %v1248_v29 = vunpack.i.l.bf16 %v1247_v27  ;;  %v645_v30 = vpack.c.bf16 %v639_v25, %v636_v24 }
  0xa6   : > { %v622_v31 = vpop.permute.xlu1 %621 }
  0xa7   : > { %v625_v32 = vsel %vm623_vm9, %v1249_v28, %v622_v31  ;;  %v650_v34 = vpack.c.bf16 %v622_v31, %v622_v31  ;;  %669 = vmatpush1.bf16.msra.mxu0 %v645_v30  ;;  %v624_v35 = vsel %vm623_vm9, %v1248_v29, %v1249_v28 }
  0xa8   : > { %v649_v38 = vpack.c.bf16 %v625_v32, %v625_v32  ;;  %v783_v39 = vpop.permute.xlu0 %782  ;;  %v648_v40 = vpack.c.bf16 %v624_v35, %v624_v35 }
  0xa9   : > { %v664_v41 = vsel %vm656_vm10, %v650_v34, 0  ;;  %v801_v42 = vsel %vm629_vm3, %v1204_v36, %v783_v39 }
  0xaa   : > { %v875_v43 = vpop.permute.xlu1 %874  ;;  %1120 = vmatprep.subr.msk.bf16.mxu0 %vm656_vm10, %v649_v38  ;;  %v658_v44 = vsel %vm656_vm10, %v648_v40, 0  ;;  %1144 = vmatpush3.bf16.msra.mxu1 %v664_v41  ;;  %v804_v46 = vpack.c.bf16 %v801_v42, %v800_v33 }
  0xab   : > { %671 = vmatpush1.bf16.msra.mxu0 %v658_v44  ;;  %1159 = vmatprep.subr.bf16.mxu1 %v1266_v11  ;;  %v898_v48 = vsel %vm629_vm3, %v1418_v17, %v875_v43 }
  0xac   : > { %v878_v45 = vpop.permute.xlu0 %877  ;;  %1149 = vmatprep.subr.bf16.mxu0 %v1266_v11 }
  0xad   : > { %1146 = vmatmul.mubr.msk.bf16.vlgmr.msra.gmra.mrb[0].mxu1 %vm652_vm11, %v651_v26 }
  0xae   : > { %v881_v47 = vpop.permute.xlu1 %880  ;;  %1121 = vmatmul.mubr.msk.bf16.vlgmr.msra.gmra.mrb[0].mxu0 %vm652_vm11, %v651_v26  ;;  %1165 = vmatprep.mubr.msk.bf16.mxu1 %vm1274_vm0, %v1266_v11 }
  0xaf   : > { %v899_v49 = vsel %vm629_vm3, %v878_v45, %v881_v47  ;;  %1150 = vmatpush3.bf16.msra.mxu0 %v804_v46  ;;  %1155 = vmatprep.mubr.msk.bf16.mxu0 %vm1274_vm0, %v1266_v11 }
  0xb0   : > { %v902_v2 = vpack.c.bf16 %v899_v49, %v898_v48  ;;  %v786_v50 = vpop.permute.xlu0 %785  ;;  %1151 = vmatprep.subr.bf16.mxu0 %v1266_v11 }
  0xb2   : > { %v1252_v51 = vpop.permute.xlu1 %1251  ;;  %1160 = vmatpush3.bf16.msra.mxu1 %v902_v2 }
  0xb3   : > { %v1253_v52 = vunpack.i.l.bf16 %v1252_v51  ;;  %1161 = vmatprep.subr.bf16.mxu1 %v1266_v11  ;;  %v1254_v59 = vunpack.i.h.bf16 %v1252_v51 }
  0xb4   : > { %v792_v53 = vpop.permute.xlu0 %791 }
  0xb5   : > { %v802_v55 = vsel %vm629_vm3, %v786_v50, %v1253_v52 }
  0xb6   : > { %v795_v54 = vpop.permute.xlu1 %794 }
  0xb7   : > { %v803_v17 = vsel %vm629_vm3, %v792_v53, %v795_v54 }
  0xb8   : > { %v805_v56 = vpack.c.bf16 %v803_v17, %v802_v55  ;;  %v884_v57 = vpop.permute.xlu0 %883 }
  0xba   : > { %v887_v58 = vpop.permute.xlu1 %886  ;;  %1152 = vmatpush3.bf16.msra.mxu0 %v805_v56 }
  0xbb   : > { %1153 = vmatprep.subr.bf16.mxu0 %v1266_v11  ;;  %v900_v61 = vsel %vm629_vm3, %v884_v57, %v887_v58 }
  0xbc   : > { %v893_v60 = vpop.permute.xlu0 %892 }
  0xbd   : > { %v901_v62 = vsel %vm629_vm3, %v1254_v59, %v893_v60 }
  0xbe   : > { %v903_v63 = vpack.c.bf16 %v901_v62, %v900_v61  ;;  %v798_v0 = vpop.permute.xlu1 %797 }
  0xbf   : > { %v806_v1 = vpack.c.bf16 %v798_v0, %v798_v0 }
  0xc0   : > { %v896_v3 = vpop.permute.xlu0 %895  ;;  %1162 = vmatpush3.bf16.msra.mxu1 %v903_v63 }
  0xc1   : > { %v812_v4 = vsel %vm656_vm10, %v806_v1, 0  ;;  %v904_v5 = vpack.c.bf16 %v896_v3, %v896_v3  ;;  %1163 = vmatprep.subr.bf16.mxu1 %v1266_v11 }
  0xc2   : > { %1154 = vmatpush3.bf16.msra.mxu0 %v812_v4 }
  0xc3   : > { %v910_v7 = vsel %vm656_vm10, %v904_v5, 0 }
  0xc4   : > { %1164 = vmatpush3.bf16.msra.mxu1 %v910_v7 }
  0xc5   : > { %1156 = vmatmul.mubr.msk.bf16.vlgmr.msra.gmra.mrb[4].mxu0 %vm652_vm11, %v807_v6 }
  0xc7   : > { %1166 = vmatmul.mubr.msk.bf16.vlgmr.msra.gmra.mrb[4].mxu1 %vm652_vm11, %v905_v8 }
  0xcf   : > { %v751_v9 = vpop.permute.xlu1 %750 }
  0xd1   : > { %v760_v11 = vpop.permute.xlu0 %759 }
  0xd3   : > { %v858_v28 = vpop.permute.xlu1 %857 }
  0xd5   : > { %v865_v31 = vpop.permute.xlu0 %864 }
  0xd7   : > { %v956_v29 = vpop.permute.xlu1 %955 }
  0xdb   : > { %v963_v41 = vpop.permute.xlu1 %962 }
 0x180   : > { %v741_v10 = vpop.f32.mrb[0].mxu1 }
 0x181   : > { %v700_v12 = vpop.f32.mrb[0].mxu0  ;;  %v755_v13 = vmul.f32 %v751_v9, %v741_v10  ;;  %v1147_v14 = vpop.f32.mrb[1].mxu1 }
 0x182   : > { %v753_v15 = vmul.f32 %v751_v9, %v700_v12  ;;  %v702_v16 = vpop.f32.mrb[1].mxu0  ;;  %v744_v18 = vpop.f32.mrb[2].mxu1 }
 0x183   : > { %v754_v19 = vmul.f32 %v751_v9, %v702_v16  ;;  %v704_v20 = vpop.f32.mrb[2].mxu0  ;;  %v1148_v21 = vpop.f32.mrb[3].mxu1  ;;  %v764_v22 = vadd.f32 %v760_v11, %v755_v13 }
 0x184   : > { %v705_v23 = vpop.f32.mrb[3].mxu0  ;;  %v762_v24 = vadd.f32 %v760_v11, %v753_v15 }
 0x185   : > { %v763_v25 = vadd.f32 %v760_v11, %v754_v19  ;;  %771 = vst.msk [vmem:[%s514_s15 + $0x8] sm:$0xf] %vm770_vm12, %v764_v22 }
 0x187   : > { %v767_v27 = vcombine.low %v762_v24, %v763_v25 }
 0x189   : > { %769 = vst [vmem:[%s514_s15] sm:$0xff] %v767_v27 }
 0x198   : > { %v848_v30 = vpop.f32.mrb[4].mxu0 }
 0x199   : > { %v860_v32 = vmul.f32 %v858_v28, %v848_v30  ;;  %v1157_v34 = vpop.f32.mrb[5].mxu0 }
 0x19a   : > { %v851_v35 = vpop.f32.mrb[6].mxu0  ;;  %v946_v36 = vpop.f32.mrb[4].mxu1 }
 0x19b   : > { %v867_v37 = vadd.f32 %v865_v31, %v860_v32  ;;  %v958_v38 = vmul.f32 %v956_v29, %v946_v36  ;;  %v1158_v39 = vpop.f32.mrb[7].mxu0  ;;  %v1167_v40 = vpop.f32.mrb[5].mxu1 }
 0x19c   : > { %v949_v42 = vpop.f32.mrb[6].mxu1 }
 0x19d   : > { %869 = vst.msk [vmem:[%s518_s23] sm:$0x3] %vm868_vm13, %v867_v37  ;;  %v965_v43 = vadd.f32 %v963_v41, %v958_v38  ;;  %v1168_v44 = vpop.f32.mrb[7].mxu1 }
 0x19f   : > { %967 = vst.msk [vmem:[%s522_s19] sm:$0x3] %vm966_vm14, %v965_v43 }
 0x1a0 PF: > { %s25_s29 = sadd.s32 1, %s1263_s29  }
 0x1a1   : > { %p22_p4 = scmp.ge.s32.totalorder %s25_s29, 4  }
 0x1a3   :  { %24 = sbr.rel (!%p22_p4) target bundleno = 1 (0x1), region = 128 }

// kernel: conv_bn_act2_forward.2
= control target key start
LH: loop header
LB: loop body
LE: loop exit
PB: predicated region body
PF: predicated region fallthrough
CT: control target
= control target key end

     0   :  { %s1478_s17 = smov 0   ;;  %s1685_s0 = inlined_call_operand.vmem [shape: bf16[2,4,326], index: 0, kind: input, shape index: {}]   ;;  %s1686_s1 = inlined_call_operand.vmem [shape: bf16[2,4,102], index: 1, kind: input, shape index: {}]   ;;  %s1687_s2 = inlined_call_operand.vmem [shape: bf16[2,4,38], index: 2, kind: input, shape index: {}]   ;;  %s1688_s3 = inlined_call_operand.vmem [shape: bf16[8,36], index: 3, kind: input, shape index: {}]   ;;  %s1689_s4 = inlined_call_operand.vmem [shape: bf16[8,36], index: 4, kind: input, shape index: {}]   ;;  %s1690_s5 = inlined_call_operand.vmem [shape: bf16[8,36], index: 5, kind: input, shape index: {}]   ;;  %s1691_s6 = inlined_call_operand.vmem [shape: f32[2,8,1], index: 6, kind: output, shape index: {0}]   ;;  %s1692_s7 = inlined_call_operand.vmem [shape: f32[2,8,1], index: 7, kind: output, shape index: {1}]   ;;  %s1693_s8 = inlined_call_operand.vmem [shape: f32[2,8,1], index: 8, kind: output, shape index: {2}]   ;;  %s1694_s9 = inlined_call_operand.vmem [shape: f32[2,8,1], index: 9, kind: output, shape index: {3}]   ;;  %s1695_s10 = inlined_call_operand.vmem [shape: f32[2,8,1], index: 10, kind: output, shape index: {4}]   ;;  %s1696_s11 = inlined_call_operand.vmem [shape: f32[2,8,1], index: 11, kind: output, shape index: {5}]  }
   0x1 LB: > { %s1231_s18 = sadd.s32 4294967295, %s1395_s17   ;;  %p1235_p0 = scmp.ge.s32.totalorder %s1395_s17, 1  ;;  %s1395_s17 = sphi %s1478_s17, %s22_s17  }
   0x2   : > { %p366_p1 = scmp.lt.s32.totalorder %s1395_s17, 3 }
   0x4   : > { %p367_p2 = pnand %p1235_p0, %p366_p1 }
   0x5   : > { %p433_p3 = scmp.lt.s32.totalorder (!%p367_p2), %s1231_s18, 1  ;;  %s1397_s27 = smov (!%p367_p2), 126   ;;  %v1398_v11 = vmov (!%p367_p2), 0.0   ;;  %v1405_v15 = vmov (!%p367_p2), 0   ;;  %vm1406_vm0 = vmmov (!%p367_p2), 0   ;;  %vm486_vm1 = vcmask (!%p367_p2), 1039360  }
   0x6   : > { %370 = sbr.rel (%p367_p2) target bundleno = 560 (0x230), region = 44  ;;  %1264 = vmatprep.subr.bf16.mxu1 (!%p367_p2), %v1398_v11  ;;  %s1399_s28 = smov (!%p367_p2), 110   ;;  %645 = vmatprep.mubr.bf16.mxu0 (!%p367_p2), %v1405_v15  ;;  %vm510_vm2 = vcmask (!%p367_p2), 900096   ;;  %vm576_vm3 = vcmask (!%p367_p2), 1043456   ;;  %vm498_vm4 = vcmask (!%p367_p2), 1031168   ;;  %vm522_vm5 = vcmask (!%p367_p2), 891904  }
   0x7   : > { %s1400_s29 = smov (!%p367_p2), 127   ;;  %s1401_s30 = smov (!%p367_p2), 109   ;;  %1270 = vmatprep.mubr.msk.bf16.mxu1 (!%p367_p2), %vm1406_vm0, %v1398_v11  ;;  %vm534_vm6 = vcmask (!%p367_p2), 883712   ;;  %vm546_vm7 = vcmask (!%p367_p2), 752640   ;;  %vm558_vm8 = vcmask (!%p367_p2), 744448   ;;  %vm570_vm9 = vcmask (!%p367_p2), 736256  }
   0x8   : > { %s1402_s12 = smov (!%p367_p2), 108   ;;  %s1403_s13 = smov (!%p367_p2), 92   ;;  %vm603_vm10 = vcmask (!%p367_p2), 1041408   ;;  %vm599_vm11 = vcmask (!%p367_p2), 293888  }
   0x9   : > { %s1404_s14 = smov (!%p367_p2), 91   ;;  %s1408_s21 = smov (!%p367_p2), 118  }
   0xa   : > { %s1409_s22 = smov (!%p367_p2), 122   ;;  %s1411_s24 = smov (!%p367_p2), 116  }
   0xb   : > { %s1412_s25 = smov (!%p367_p2), 107  }
   0xd   : > { %s1698_s18 = smov (!%p433_p3, %s1231_s18), 1 }
   0xe   : > { %s1294_s19 = smul.u32 6, %s1698_s18  ;;  %s1237_s20 = sshll.u32 %s1698_s18, 1 }
   0xf   : > { %s441_s23 = scalar_lea.vmem %s1686_s1, %s1237_s20 }
  0x10   : > { %s437_s26 = scalar_lea.vmem %s1685_s0, %s1294_s19  ;;  %v775_v0 = vld [vmem:[%s441_s23] sm:$0x3]  ;;  %s445_s19 = scalar_lea.vmem %s1687_s2, %s1237_s20 }
  0x11   : > { %v471_v1 = vld [vmem:[%s437_s26] sm:$0x3f]  ;;  %v1498_v2 = vunpack.c.l.bf16 %v775_v0  ;;  %s1407_s20 = smov 90   ;;  %s1410_s23 = smov 117  }
  0x12   : > { %v1500_v3 = vunpack.c.l.bf16 %v471_v1  ;;  %v1502_v4 = vunpack.c.h.bf16 %v471_v1  ;;  %v887_v14 = vld [vmem:[%s445_s19] sm:$0x3]  ;;  %s1413_s26 = smov 121  }
  0x13   : > { %v778_v8 = vcombine.low %v1498_v2, %v1498_v2  ;;  %v1535_v17 = vunpack.c.l.bf16 %v887_v14 }
  0x14   : > { %v1334_v5 = vpack.i.bf16 %v1498_v2, %v1500_v3  ;;  %v479_v6 = vcombine.low %v1502_v4, %v1502_v4  ;;  %v478_v7 = vcombine.low %v1500_v3, %v1500_v3  ;;  %v1516_v10 = vcombine.high %v1500_v3, %v1500_v3 }
  0x15   : > { %v890_v18 = vcombine.low %v1535_v17, %v1535_v17  ;;  %v1384_v19 = vpack.i.bf16 %v1535_v17, %v778_v8 }
  0x16   : > { %1335 = vrot.lane.b32.xlu0 %v1334_v5, %s1397_s27  ;;  %v1349_v9 = vpack.i.bf16 %v479_v6, %v1500_v3  ;;  %v1354_v12 = vpack.i.bf16 %v778_v8, %v478_v7  ;;  %v1344_v13 = vpack.i.bf16 %v1502_v4, %v1516_v10  ;;  %v1379_v16 = vpack.i.bf16 %v1516_v10, %v1500_v3 }
  0x18   : > { %1350 = vrot.lane.b32.xlu1 %v1349_v9, %s1399_s28 }
  0x1a   : > { %1340 = vrot.lane.b32.xlu0 %v1349_v9, %s1400_s29 }
  0x1c   : > { %1355 = vrot.lane.b32.xlu1 %v1354_v12, %s1400_s29 }
  0x1e   : > { %1345 = vrot.lane.b32.xlu0 %v1344_v13, %s1397_s27 }
  0x20   : > { %504 = vrot.lane.b32.xlu1 %v478_v7, %s1399_s28  ;;  %s1414_s28 = smov 120  }
  0x22   : > { %1360 = vrot.lane.b32.xlu0 %v1344_v13, %s1401_s30 }
  0x24   : > { %1365 = vrot.lane.b32.xlu1 %v1349_v9, %s1402_s12 }
  0x26   : > { %1370 = vrot.lane.b32.xlu0 %v1344_v13, %s1403_s13 }
  0x28   : > { %1375 = vrot.lane.b32.xlu1 %v1349_v9, %s1404_s14 }
  0x2a   : > { %516 = vrot.lane.b32.xlu0 %v1500_v3, %s1401_s30  ;;  %s1417_s30 = smov 114  }
  0x2c   : > { %528 = vrot.lane.b32.xlu1 %v478_v7, %s1402_s12 }
  0x2e   : > { %540 = vrot.lane.b32.xlu0 %v1500_v3, %s1403_s13 }
  0x30   : > { %552 = vrot.lane.b32.xlu1 %v478_v7, %s1404_s14 }
  0x32   : > { %1380 = vrot.lane.b32.xlu0 %v1379_v16, %s1407_s20 }
  0x34   : > { %568 = vrot.lane.b32.xlu1 %v1502_v4, %s1407_s20  ;;  %s1239_s20 = sshll.u32 %s1698_s18, 3 }
  0x35   : > { %s465_s15 = scalar_lea.vmem %s1695_s10, %s1239_s20 }
  0x36   : > { %785 = vrot.lane.b32.xlu0 %v778_v8, %s1408_s21  ;;  %s469_s21 = scalar_lea.vmem %s1696_s11, %s1239_s20 }
  0x38   : > { %891 = vrot.lane.b32.xlu1 %v890_v18, %s1400_s29  ;;  %s1416_s29 = smov 106  }
  0x3a   : > { %894 = vrot.lane.b32.xlu0 %v1535_v17, %s1397_s27  ;;  %s1415_s27 = smov 115  }
  0x3c   : > { %897 = vrot.lane.b32.xlu1 %v890_v18, %s1409_s22 }
  0x3e   : > { %788 = vrot.lane.b32.xlu0 %v1498_v2, %s1410_s23  ;;  %s449_s23 = scalar_lea.vmem %s1691_s6, %s1239_s20 }
  0x40   : > { %1385 = vrot.lane.b32.xlu1 %v1384_v19, %s1411_s24 }
  0x42   : > { %794 = vrot.lane.b32.xlu0 %v1498_v2, %s1402_s12  ;;  %s461_s12 = scalar_lea.vmem %s1694_s9, %s1239_s20 }
  0x44   : > { %797 = vrot.lane.b32.xlu1 %v778_v8, %s1412_s25 }
  0x46   : > { %900 = vrot.lane.b32.xlu0 %v1535_v17, %s1413_s26  ;;  %s453_s26 = scalar_lea.vmem %s1692_s7, %s1239_s20 }
  0x48   : > { %903 = vrot.lane.b32.xlu1 %v890_v18, %s1414_s28 }
  0x4a   : > { %909 = vrot.lane.b32.xlu0 %v890_v18, %s1415_s27 }
  0x4c   : > { %800 = vrot.lane.b32.xlu1 %v1498_v2, %s1416_s29  ;;  %s457_s29 = scalar_lea.vmem %s1693_s8, %s1239_s20 }
  0x4e   : > { %912 = vrot.lane.b32.xlu0 %v1535_v17, %s1417_s30 }
  0x88   : > { %v1552_v20 = vpop.permute.xlu0 %1335 }
  0x89   : > { %v1337_v31 = vunpack.i.l.bf16 %v1552_v20 }
  0x8a   : > { %v1351_v21 = vpop.permute.xlu1 %1350 }
  0x8b   : > { %v1353_v25 = vunpack.i.h.bf16 %v1351_v21  ;;  %v1352_v26 = vunpack.i.l.bf16 %v1351_v21 }
  0x8c   : > { %v1341_v22 = vpop.permute.xlu0 %1340 }
  0x8d   : > { %v1343_v23 = vunpack.i.h.bf16 %v1341_v22  ;;  %v1342_v24 = vunpack.i.l.bf16 %v1341_v22  ;;  %v512_v37 = vsel %vm510_vm2, %v1352_v26, %v1353_v25 }
  0x8e   : > { %v1554_v27 = vpop.permute.xlu1 %1355 }
  0x8f   : > { %v1357_v28 = vunpack.i.l.bf16 %v1554_v27  ;;  %v488_v29 = vsel %vm486_vm1, %v1342_v24, %v1343_v23  ;;  %v579_v36 = vsel %vm576_vm3, %v1502_v4, %v1343_v23 }
  0x90   : > { %v1346_v30 = vpop.permute.xlu0 %1345  ;;  %v578_v38 = vsel %vm576_vm3, %v1516_v10, %v488_v29 }
  0x91   : > { %v1348_v32 = vunpack.i.h.bf16 %v1346_v30  ;;  %v1347_v33 = vunpack.i.l.bf16 %v1346_v30  ;;  %v487_v34 = vsel %vm486_vm1, %v1357_v28, %v1342_v24  ;;  %v1338_v30 = vunpack.i.h.bf16 %v1552_v20  ;;  %v598_v20 = vld [vmem:[%s1688_s3] sm:$0xf] }
  0x92   : > { %v505_v35 = vpop.permute.xlu1 %504  ;;  %v577_v46 = vsel %vm576_vm3, %v1500_v3, %v487_v34 }
  0x93   : > { %v511_v39 = vsel %vm510_vm2, %v505_v35, %v1352_v26  ;;  %v582_v40 = vsel %vm576_vm3, %v1348_v32, %v1353_v25  ;;  %v500_v41 = vsel %vm498_vm4, %v1347_v33, %v1348_v32  ;;  %v499_v42 = vsel %vm498_vm4, %v1337_v31, %v1347_v33 }
  0x94   : > { %v1361_v43 = vpop.permute.xlu0 %1360  ;;  %v591_v44 = vpack.c.bf16 %v582_v40, %v579_v36  ;;  %v581_v45 = vsel %vm576_vm3, %v500_v41, %v512_v37  ;;  %v580_v47 = vsel %vm576_vm3, %v499_v42, %v511_v39  ;;  %v1358_v31 = vunpack.i.h.bf16 %v1554_v27 }
  0x95   : > { %v590_v48 = vpack.c.bf16 %v581_v45, %v578_v38  ;;  %v589_v49 = vpack.c.bf16 %v580_v47, %v577_v46  ;;  %v1363_v50 = vunpack.i.h.bf16 %v1361_v43  ;;  %v1362_v51 = vunpack.i.l.bf16 %v1361_v43 }
  0x96   : > { %v1366_v52 = vpop.permute.xlu1 %1365  ;;  %1265 = vmatpush3.bf16.msra.mxu1 %v591_v44  ;;  %v803_v27 = vsel %vm576_vm3, %v1498_v2, %v1358_v31 }
  0x97   : > { %v1368_v53 = vunpack.i.h.bf16 %v1366_v52  ;;  %v1367_v54 = vunpack.i.l.bf16 %v1366_v52  ;;  %613 = vmatprep.subr.bf16.mxu0 %v590_v48  ;;  %1266 = vmatprep.subr.bf16.mxu1 %v1398_v11  ;;  %v524_v59 = vsel %vm522_vm5, %v1362_v51, %v1363_v50 }
  0x98   : > { %v1371_v55 = vpop.permute.xlu0 %1370  ;;  %614 = vmatpush1.bf16.msra.mxu0 %v589_v49 }
  0x99   : > { %v1373_v56 = vunpack.i.h.bf16 %v1371_v55  ;;  %v1372_v57 = vunpack.i.l.bf16 %v1371_v55  ;;  %v536_v62 = vsel %vm534_vm6, %v1367_v54, %v1368_v53  ;;  %v585_v3 = vsel %vm576_vm3, %v1363_v50, %v1368_v53 }
  0x9a   : > { %v1376_v58 = vpop.permute.xlu1 %1375  ;;  %v584_v7 = vsel %vm576_vm3, %v524_v59, %v536_v62 }
  0x9b   : > { %v1378_v60 = vunpack.i.h.bf16 %v1376_v58  ;;  %v1377_v61 = vunpack.i.l.bf16 %v1376_v58  ;;  %v548_v63 = vsel %vm546_vm7, %v1372_v57, %v1373_v56 }
  0x9c   : > { %v517_v0 = vpop.permute.xlu0 %516 }
  0x9d   : > { %v560_v1 = vsel %vm558_vm8, %v1377_v61, %v1378_v60  ;;  %v588_v4 = vsel %vm576_vm3, %v1373_v56, %v1378_v60  ;;  %v523_v14 = vsel %vm522_vm5, %v517_v0, %v1362_v51 }
  0x9e   : > { %v529_v5 = vpop.permute.xlu1 %528  ;;  %v594_v6 = vpack.c.bf16 %v588_v4, %v585_v3  ;;  %v587_v8 = vsel %vm576_vm3, %v548_v63, %v560_v1  ;;  %v810_v63 = vld [vmem:[%s1689_s4] sm:$0xf]  ;;  %v694_v3 = vlaneseq }
  0x9f   : > { %v593_v9 = vpack.c.bf16 %v587_v8, %v584_v7  ;;  %v535_v12 = vsel %vm534_vm6, %v529_v5, %v1367_v54  ;;  %v922_v1 = vld [vmem:[%s1690_s5] sm:$0xf] }
  0xa0   : > { %v541_v10 = vpop.permute.xlu0 %540  ;;  %1267 = vmatpush3.bf16.msra.mxu1 %v594_v6  ;;  %v583_v18 = vsel %vm576_vm3, %v523_v14, %v535_v12  ;;  %v1623_v4 = vand.u32 127, %v694_v3 }
  0xa1   : > { %615 = vmatprep.subr.bf16.mxu0 %v593_v9  ;;  %1268 = vmatprep.subr.bf16.mxu1 %v1398_v11  ;;  %v547_v15 = vsel %vm546_vm7, %v541_v10, %v1372_v57 }
  0xa2   : > { %v553_v13 = vpop.permute.xlu1 %552  ;;  %v696_v5 = vadd.s32 128, %v1623_v4  ;;  %v1631_v8 = vmul.u32.u64.low 3817748708, %v1623_v4  ;;  %v1632_v9 = vmul.u32.u64.high 3817748708, %v1623_v4, %v1631_v8 }
  0xa3   : > { %v559_v16 = vsel %vm558_vm8, %v553_v13, %v1377_v61  ;;  %vm759_vm8 = vcmask 261120  }
  0xa4   : > { %v586_v19 = vsel %vm576_vm3, %v547_v15, %v559_v16  ;;  %v1381_v21 = vpop.permute.xlu0 %1380  ;;  %v1634_v10 = vmul.u32.u64.low 3817748708, %v696_v5  ;;  %v1635_v12 = vmul.u32.u64.high 3817748708, %v696_v5, %v1634_v10  ;;  %v704_v14 = vshrl.u32 %v1632_v9, 4 }
  0xa5   : > { %v1383_v22 = vunpack.i.h.bf16 %v1381_v21  ;;  %v1382_v23 = vunpack.i.l.bf16 %v1381_v21  ;;  %v592_v24 = vpack.c.bf16 %v586_v19, %v583_v18 }
  0xa6   : > { %v569_v25 = vpop.permute.xlu1 %568  ;;  %v715_v15 = vshrl.u32 %v1635_v12, 4  ;;  %v705_v18 = vmul.u32 18, %v704_v14 }
  0xa7   : > { %v572_v26 = vsel %vm570_vm9, %v1383_v22, %v569_v25  ;;  %v597_v28 = vpack.c.bf16 %v569_v25, %v569_v25  ;;  %616 = vmatpush1.bf16.msra.mxu0 %v592_v24  ;;  %v571_v29 = vsel %vm570_vm9, %v1382_v23, %v1383_v22 }
  0xa8   : > { %v596_v32 = vpack.c.bf16 %v572_v26, %v572_v26  ;;  %v786_v33 = vpop.permute.xlu0 %785  ;;  %v595_v34 = vpack.c.bf16 %v571_v29, %v571_v29  ;;  %v716_v19 = vmul.u32 18, %v715_v15  ;;  %v706_v22 = vsub.s32 %v1623_v4, %v705_v18 }
  0xa9   : > { %v611_v35 = vsel %vm603_vm10, %v597_v28, 0  ;;  %v804_v36 = vsel %vm576_vm3, %v1338_v30, %v786_v33  ;;  %v1642_v28 = vmul.u32.u64.low 3435973837, %v1623_v4  ;;  %v1643_v29 = vmul.u32.u64.high 3435973837, %v1623_v4, %v1642_v28 }
  0xaa   : > { %v892_v37 = vpop.permute.xlu1 %891  ;;  %1245 = vmatprep.subr.msk.bf16.mxu0 %vm603_vm10, %v596_v32  ;;  %1269 = vmatpush3.bf16.msra.mxu1 %v611_v35  ;;  %v605_v38 = vsel %vm603_vm10, %v595_v34, 0  ;;  %v807_v40 = vpack.c.bf16 %v804_v36, %v803_v27  ;;  %v717_v23 = vsub.s32 %v696_v5, %v716_v19  ;;  %vm731_vm14 = vcmp.ne.s32.totalorder %v706_v22, 0 }
  0xab   : > { %618 = vmatpush1.bf16.msra.mxu0 %v605_v38  ;;  %1284 = vmatprep.subr.bf16.mxu1 %v1398_v11  ;;  %v915_v42 = vsel %vm576_vm3, %v1535_v17, %v892_v37  ;;  %vm734_vm15 = vcmp.lt.s32.totalorder %v706_v22, 0  ;;  %v740_v25 = vadd.s32 18, %v706_v22 }
  0xac   : > { %v895_v39 = vpop.permute.xlu0 %894  ;;  %1274 = vmatprep.subr.bf16.mxu0 %v1398_v11  ;;  %vm735_vm1 = vcmp.lt.s32.totalorder %v717_v23, 0  ;;  %v741_v26 = vadd.s32 18, %v717_v23  ;;  %v1646_v31 = vmul.u32.u64.low 2863311531, %v1623_v4  ;;  %v1647_v32 = vmul.u32.u64.high 2863311531, %v1623_v4, %v1646_v31 }
  0xad   : > { %1271 = vmatmul.mubr.msk.bf16.vlgmr.msra.gmra.mrb[0].mxu1 %vm599_vm11, %v598_v20 }
  0xae   : > { %v898_v41 = vpop.permute.xlu1 %897  ;;  %1246 = vmatmul.mubr.msk.bf16.vlgmr.msra.gmra.mrb[0].mxu0 %vm599_vm11, %v598_v20  ;;  %1290 = vmatprep.mubr.msk.bf16.mxu1 %vm1406_vm0, %v1398_v11  ;;  %v863_v20 = vshrl.u32 %v1643_v29, 3 }
  0xaf   : > { %v916_v43 = vsel %vm576_vm3, %v895_v39, %v898_v41  ;;  %1275 = vmatpush3.bf16.msra.mxu0 %v807_v40  ;;  %1280 = vmatprep.mubr.msk.bf16.mxu0 %vm1406_vm0, %v1398_v11  ;;  %vm732_vm0 = vcmp.ne.s32.totalorder %v717_v23, 0 }
  0xb0   : > { %v919_v2 = vpack.c.bf16 %v916_v43, %v915_v42  ;;  %v789_v44 = vpop.permute.xlu0 %788  ;;  %1276 = vmatprep.subr.bf16.mxu0 %v1398_v11  ;;  %vm738_vm4 = vmand %vm735_vm1, %vm732_vm0  ;;  %vm877_vm0 = vcmask 654336  }
  0xb1   : > { %v744_v34 = vsel %vm738_vm4, %v741_v26, %v717_v23 }
  0xb2   : > { %v1386_v45 = vpop.permute.xlu1 %1385  ;;  %1285 = vmatpush3.bf16.msra.mxu1 %v919_v2  ;;  %vm747_vm7 = vcmp.lt.s32.totalorder %v744_v34, 16 }
  0xb3   : > { %v1387_v46 = vunpack.i.l.bf16 %v1386_v45  ;;  %1286 = vmatprep.subr.bf16.mxu1 %v1398_v11  ;;  %v1388_v53 = vunpack.i.h.bf16 %v1386_v45 }
  0xb4   : > { %v795_v47 = vpop.permute.xlu0 %794 }
  0xb5   : > { %v805_v49 = vsel %vm576_vm3, %v789_v44, %v1387_v46  ;;  %v975_v46 = vshrl.u32 %v1647_v32, 2 }
  0xb6   : > { %v798_v48 = vpop.permute.xlu1 %797 }
  0xb7   : > { %v806_v17 = vsel %vm576_vm3, %v795_v47, %v798_v48 }
  0xb8   : > { %v808_v50 = vpack.c.bf16 %v806_v17, %v805_v49  ;;  %v901_v51 = vpop.permute.xlu0 %900 }
  0xba   : > { %v904_v52 = vpop.permute.xlu1 %903  ;;  %1277 = vmatpush3.bf16.msra.mxu0 %v808_v50  ;;  %v864_v50 = vmul.u32 10, %v863_v20 }
  0xbb   : > { %1278 = vmatprep.subr.bf16.mxu0 %v1398_v11  ;;  %v917_v55 = vsel %vm576_vm3, %v901_v51, %v904_v52 }
  0xbc   : > { %v910_v54 = vpop.permute.xlu0 %909 }
  0xbd   : > { %v918_v56 = vsel %vm576_vm3, %v1388_v53, %v910_v54  ;;  %vm737_vm3 = vmand %vm734_vm15, %vm731_vm14  ;;  %v976_v53 = vmul.u32 6, %v975_v46 }
  0xbe   : > { %v920_v57 = vpack.c.bf16 %v918_v56, %v917_v55  ;;  %v801_v58 = vpop.permute.xlu1 %800  ;;  %v743_v33 = vsel %vm737_vm3, %v740_v25, %v706_v22  ;;  %v865_v55 = vsub.s32 %v1623_v4, %v864_v50  ;;  %vm764_vm3 = vcmask 7168  }
  0xbf   : > { %v809_v59 = vpack.c.bf16 %v801_v58, %v801_v58  ;;  %vm746_vm6 = vcmp.lt.s32.totalorder %v743_v33, 16  ;;  %v977_v56 = vsub.s32 %v1623_v4, %v976_v53 }
  0xc0   : > { %v913_v60 = vpop.permute.xlu0 %912  ;;  %1287 = vmatpush3.bf16.msra.mxu1 %v920_v57  ;;  %vm868_vm9 = vcmp.ne.s32.totalorder %v865_v55, 0  ;;  %v871_v57 = vadd.s32 10, %v865_v55 }
  0xc1   : > { %v815_v61 = vsel %vm603_vm10, %v809_v59, 0  ;;  %v921_v62 = vpack.c.bf16 %v913_v60, %v913_v60  ;;  %1288 = vmatprep.subr.bf16.mxu1 %v1398_v11  ;;  %v697_v11 = vadd.s32 256, %v1623_v4  ;;  %v983_v58 = vadd.s32 6, %v977_v56 }
  0xc2   : > { %1279 = vmatpush3.bf16.msra.mxu0 %v815_v61 }
  0xc3   : > { %v927_v0 = vsel %vm603_vm10, %v921_v62, 0  ;;  %v1627_v6 = vmul.u32.u64.low 3817748708, %v697_v11  ;;  %v1628_v7 = vmul.u32.u64.high 3817748708, %v697_v11, %v1627_v6  ;;  %vm869_vm10 = vcmp.lt.s32.totalorder %v865_v55, 0 }
  0xc4   : > { %1289 = vmatpush3.bf16.msra.mxu1 %v927_v0 }
  0xc5   : > { %1281 = vmatmul.mubr.msk.bf16.vlgmr.msra.gmra.mrb[4].mxu0 %vm599_vm11, %v810_v63  ;;  %v726_v13 = vshrl.u32 %v1628_v7, 4 }
  0xc7   : > { %1291 = vmatmul.mubr.msk.bf16.vlgmr.msra.gmra.mrb[4].mxu1 %vm599_vm11, %v922_v1  ;;  %v727_v16 = vmul.u32 18, %v726_v13  ;;  %vm980_vm11 = vcmp.ne.s32.totalorder %v977_v56, 0 }
  0xc9   : > { %v728_v21 = vsub.s32 %v697_v11, %v727_v16 }
  0xcb   : > { %vm733_vm12 = vcmp.ne.s32.totalorder %v728_v21, 0  ;;  %vm736_vm13 = vcmp.lt.s32.totalorder %v728_v21, 0  ;;  %v742_v24 = vadd.s32 18, %v728_v21 }
  0xcc   : > { %vm739_vm2 = vmand %vm736_vm13, %vm733_vm12  ;;  %vm981_vm12 = vcmp.lt.s32.totalorder %v977_v56, 0 }
  0xcd   : > { %v745_v30 = vsel %vm739_vm2, %v742_v24, %v728_v21  ;;  %vm870_vm13 = vmand %vm869_vm10, %vm868_vm9  ;;  %vm989_vm2 = vcmask 195584  }
  0xce   : > { %vm748_vm5 = vcmp.lt.s32.totalorder %v745_v30, 16  ;;  %vm982_vm14 = vmand %vm981_vm12, %vm980_vm11  ;;  %v872_v59 = vsel %vm870_vm13, %v871_v57, %v865_v55 }
  0xcf   : > { %v984_v60 = vsel %vm982_vm14, %v983_v58, %v977_v56  ;;  %vm873_vm15 = vcmp.lt.s32.totalorder %v872_v59, 8 }
  0xd0   : > { %vm985_vm1 = vcmp.lt.s32.totalorder %v984_v60, 4 }
 0x180   : > { %v688_v35 = vpop.f32.mrb[0].mxu1 }
 0x181   : > { %v647_v36 = vpop.f32.mrb[0].mxu0  ;;  %v757_v37 = vsel %vm748_vm5, %v688_v35, 0.0  ;;  %v1272_v38 = vpop.f32.mrb[1].mxu1 }
 0x182   : > { %v755_v27 = vsel %vm746_vm6, %v647_v36, 0.0  ;;  %v649_v39 = vpop.f32.mrb[1].mxu0  ;;  %v768_v40 = vmul.f32 %v757_v37, %v757_v37  ;;  %v691_v41 = vpop.f32.mrb[2].mxu1  ;;  %v760_v44 = vsel %vm759_vm8, %v757_v37, 0.0 }
 0x183   : > { %v766_v42 = vmul.f32 %v755_v27, %v755_v27  ;;  %v756_v43 = vsel %vm747_vm7, %v649_v39, 0.0  ;;  %v651_v2 = vpop.f32.mrb[2].mxu0  ;;  %v1273_v45 = vpop.f32.mrb[3].mxu1 }
 0x184   : > { %v758_v47 = vadd.f32 %v756_v43, %v755_v27  ;;  %v767_v48 = vmul.f32 %v756_v43, %v756_v43  ;;  %v652_v49 = vpop.f32.mrb[3].mxu0  ;;  %v770_v17 = vsel %vm759_vm8, %v768_v40, 0.0 }
 0x186   : > { %v761_v51 = vadd.f32 %v760_v44, %v758_v47  ;;  %v769_v52 = vadd.f32 %v767_v48, %v766_v42 }
 0x188   : > { %762 = vadd.xlane.f32.xlu1 %v761_v51  ;;  %v771_v54 = vadd.f32 %v770_v17, %v769_v52 }
 0x18a   : > { %772 = vadd.xlane.f32.xlu0 %v771_v54 }
 0x198   : > { %v851_v61 = vpop.f32.mrb[4].mxu0 }
 0x199   : > { %v876_v62 = vsel %vm873_vm15, %v851_v61, 0.0  ;;  %v1282_v63 = vpop.f32.mrb[5].mxu0 }
 0x19a   : > { %v882_v0 = vmul.f32 %v876_v62, %v876_v62  ;;  %v854_v1 = vpop.f32.mrb[6].mxu0  ;;  %v963_v3 = vpop.f32.mrb[4].mxu1  ;;  %v878_v4 = vsel %vm877_vm0, %v876_v62, 0.0 }
 0x19b   : > { %v988_v11 = vsel %vm985_vm1, %v963_v3, 0.0  ;;  %v1292_v5 = vpop.f32.mrb[5].mxu1  ;;  %879 = vadd.xlane.f32.xlu0 %v878_v4  ;;  %v1283_v6 = vpop.f32.mrb[7].mxu0 }
 0x19c   : > { %v994_v7 = vmul.f32 %v988_v11, %v988_v11  ;;  %v966_v8 = vpop.f32.mrb[6].mxu1  ;;  %v883_v9 = vsel %vm877_vm0, %v882_v0, 0.0  ;;  %v990_v10 = vsel %vm989_vm2, %v988_v11, 0.0 }
 0x19d   : > { %v1293_v12 = vpop.f32.mrb[7].mxu1  ;;  %884 = vadd.xlane.f32.xlu1 %v883_v9 }
 0x19e   : > { %v995_v13 = vsel %vm989_vm2, %v994_v7, 0.0 }
 0x19f   : > { %991 = vadd.xlane.f32.xlu0 %v990_v10 }
 0x1a1   : > { %996 = vadd.xlane.f32.xlu1 %v995_v13 }
 0x215   : > { %v763_v14 = vpop.xlane.xlu1 %762 }
 0x216   : > { %765 = vst.msk [vmem:[%s449_s23] sm:$0xff] %vm764_vm3, %v763_v14 }
 0x217   : > { %v773_v15 = vpop.xlane.xlu0 %772 }
 0x218   : > { %774 = vst.msk [vmem:[%s453_s26] sm:$0xff] %vm764_vm3, %v773_v15 }
 0x228   : > { %v880_v16 = vpop.xlane.xlu0 %879 }
 0x229   : > { %881 = vst.msk [vmem:[%s457_s29] sm:$0xff] %vm764_vm3, %v880_v16 }
 0x22a   : > { %v885_v18 = vpop.xlane.xlu1 %884 }
 0x22b   : > { %886 = vst.msk [vmem:[%s461_s12] sm:$0xff] %vm764_vm3, %v885_v18 }
 0x22c   : > { %v992_v19 = vpop.xlane.xlu0 %991 }
 0x22d   : > { %993 = vst.msk [vmem:[%s465_s15] sm:$0xff] %vm764_vm3, %v992_v19 }
 0x22e   : > { %v997_v21 = vpop.xlane.xlu1 %996 }
 0x22f   : > { %998 = vst.msk [vmem:[%s469_s21] sm:$0xff] %vm764_vm3, %v997_v21 }
 0x230 PF: > { %s22_s17 = sadd.s32 1, %s1395_s17  }
 0x231   : > { %p19_p4 = scmp.ge.s32.totalorder %s22_s17, 4  }
 0x233   :  { %21 = sbr.rel (!%p19_p4) target bundleno = 1 (0x1), region = 140 }

</bundles_post_ra>
